<compile_context>
chip_gen: v7x
topology: tpu7x:2x2x1
jax: 0.10.0
libtpu: 0.0.40
codegen_flags: <defaults>
</compile_context>

<pallas_src>
from functools import partial

import jax
import jax.numpy as jnp
from jax.experimental import pallas as pl
from jax.experimental.pallas import tpu as pltpu


def _round_up(v, m):
    return (v + m - 1) // m * m


def lstm_predictor_kernel(x_ref, w_ih_ref, w_hh_ref, b_ref, w_fc_ref, b_fc_ref,
                          out_ref, gx_ref, h_ref, c_ref, *,
                          seq_len, chunk_len, batch_shard, hidden_pad,
                          input_size):
    """One (batch-shard, time-chunk) grid step of the LSTM forward.

    x_ref:    (Tc*Bs, I)    this chunk, time-major rows (row = t*Bs + b)
    w_ih_ref: (I, 4Hp)      W_ih^T, per-gate zero-padded to Hp; i/f/o cols *0.5
    w_hh_ref: (Hp, 4Hp)     W_hh^T, same padding / pre-scaling
    b_ref:    (1, 4Hp)      b_ih + b_hh, same padding / pre-scaling
    w_fc_ref: (Hp, Op)      W_fc^T, zero-padded
    b_fc_ref: (1, Op)
    out_ref:  (Bs, Op)      written on the last time chunk only
    gx_ref:   (Tc*Bs, 4Hp)  scratch: hoisted input projection for this chunk
    h_ref/c_ref: (Bs, Hp)   persistent recurrent state across time chunks

    Gate order matches PyTorch (i, f, g, o).  The i/f/o pre-activations arrive
    pre-scaled by 0.5 so sigmoid(x) == 0.5*tanh(x/2) + 0.5 costs only one
    full-width tanh per step (plus tanh(c_new)).
    """
    T, Tc, Bs, Hp, I = seq_len, chunk_len, batch_shard, hidden_pad, input_size
    j = pl.program_id(1)

    # ---- reset recurrent state at the start of each shard's time loop ------
    @pl.when(j == 0)
    def _():
        h_ref[...] = jnp.zeros_like(h_ref)
        c_ref[...] = jnp.zeros_like(c_ref)

    # ---- hoisted input projection for the whole chunk (no recurrence dep) --
    x_blk = x_ref[...]
    if I >= 128:
        gx = jnp.dot(x_blk, w_ih_ref[...], preferred_element_type=jnp.float32)
        gx = gx + b_ref[...]
    else:
        # Tiny contraction dim: K would be padded to 128/256 on the MXU, so do
        # it as I broadcast FMAs on the VPU instead.
        w_ih = w_ih_ref[...]
        gx = x_blk[:, 0:1] * w_ih[0:1, :]
        for k in range(1, I):
            gx = gx + x_blk[:, k:k + 1] * w_ih[k:k + 1, :]
        gx = gx + b_ref[...]
    gx_ref[...] = gx

    # ---- serial recurrence over this chunk ----------------------------------
    w_hh = w_hh_ref[...]                 # resident MXU RHS for all steps
    has_tail = (T % Tc) != 0             # static: does the last chunk have pad?

    def step(t, carry):
        h, c = carry
        row = pl.multiple_of(t * Bs, Bs)                     # sublane-aligned
        gates = gx_ref[pl.ds(row, Bs), :] + jnp.dot(
            h, w_hh, preferred_element_type=jnp.float32)     # (Bs, 4Hp)

        # Single EUP pass over all four gates; gate blocks are 128-lane aligned.
        tg = jnp.tanh(gates)
        if_act = tg[:, 0:2 * Hp] * 0.5 + 0.5                 # sigmoid(i), sigmoid(f)
        g_act = tg[:, 2 * Hp:3 * Hp]                         # tanh(g)
        o_act = tg[:, 3 * Hp:4 * Hp] * 0.5 + 0.5             # sigmoid(o)
        i_act = if_act[:, 0:Hp]
        f_act = if_act[:, Hp:2 * Hp]

        c_new = f_act * c + i_act * g_act
        h_new = o_act * jnp.tanh(c_new)

        if has_tail:                       # skip zero-padded timesteps (static)
            valid = (j * Tc + t) < T
            h_new = jnp.where(valid, h_new, h)
            c_new = jnp.where(valid, c_new, c)
        return h_new, c_new

    unroll = True if Tc <= 32 else 8
    h_last, c_last = jax.lax.fori_loop(
        0, Tc, step, (h_ref[...], c_ref[...]), unroll=unroll)
    h_ref[...] = h_last
    c_ref[...] = c_last

    # ---- final Linear on the last hidden state (lane-dense padded output) --
    @pl.when(j == pl.num_programs(1) - 1)
    def _():
        out_ref[...] = (
            jnp.dot(h_last, w_fc_ref[...], preferred_element_type=jnp.float32)
            + b_fc_ref[...]
        )


def _pad_gate_cols(w, H, Hp):
    """(K, 4H) -> (K, 4Hp): per-gate zero-pad to Hp lanes; pre-scale the
    i/f/o (sigmoid) gate blocks by 0.5 for the sigmoid-via-tanh identity."""
    blocks = []
    for g in range(4):
        blk = w[:, g * H:(g + 1) * H]
        if g != 2:                      # gates i, f, o are sigmoids
            blk = blk * 0.5
        blocks.append(jnp.pad(blk, ((0, 0), (0, Hp - H))))
    return jnp.concatenate(blocks, axis=1)


def lstm_predictor(x, w_ih, w_hh, b_ih, b_hh, w_fc, b_fc):
    """x: (B, T, I) float32.  Weights use PyTorch shapes:
       w_ih (4H, I), w_hh (4H, H), b_ih/b_hh (4H,), w_fc (O, H), b_fc (O,)."""
    B, T, I = x.shape
    H = w_hh.shape[1]
    O = w_fc.shape[0]                           # == input_size in this module

    Hp = _round_up(H, 128)                      # lane-aligned gate blocks
    O_pad = _round_up(O, 128)                   # lane-dense output

    # Batch sharding: 2 shards feed both v7x TensorCores; 1 shard otherwise.
    num_shards = 2 if _round_up(B, 8) >= 16 else 1
    B_shard = _round_up(-(-B // num_shards), 8)
    B_pad = num_shards * B_shard

    # Time chunking: bound VMEM-resident state to a constant, independent of T.
    gx_budget = 4 * 1024 * 1024                 # <= 4 MiB for the gx scratch
    Tc = max(1, min(T, 64, gx_budget // (B_shard * 4 * Hp * 4)))
    num_chunks = -(-T // Tc)
    T_pad = num_chunks * Tc

    # ---- arrange x: (B,T,I) -> (shard, chunk, t, b, I) -> 2-D time-major ---
    x_f = jnp.asarray(x, jnp.float32)
    x_p = jnp.pad(x_f, ((0, B_pad - B), (0, T_pad - T), (0, 0)))
    x_r = x_p.reshape(num_shards, B_shard, num_chunks, Tc, I)
    x_r = jnp.transpose(x_r, (0, 2, 3, 1, 4))   # (S, C, Tc, B_shard, I)
    x_2d = x_r.reshape(num_shards * num_chunks * Tc * B_shard, I)

    # ---- weights: transpose, per-gate pad to Hp, pre-scale sigmoid gates ---
    w_ih_t = _pad_gate_cols(jnp.asarray(w_ih, jnp.float32).T, H, Hp)  # (I,4Hp)
    w_hh_t = _pad_gate_cols(jnp.asarray(w_hh, jnp.float32).T, H, Hp)  # (H,4Hp)
    w_hh_t = jnp.pad(w_hh_t, ((0, Hp - H), (0, 0)))                   # (Hp,4Hp)
    b = (jnp.asarray(b_ih, jnp.float32)
         + jnp.asarray(b_hh, jnp.float32)).reshape(1, 4 * H)
    b = _pad_gate_cols(b, H, Hp)                                      # (1,4Hp)
    w_fc_t = jnp.pad(jnp.asarray(w_fc, jnp.float32).T,
                     ((0, Hp - H), (0, O_pad - O)))                   # (Hp,Op)
    b_fc_p = jnp.pad(jnp.asarray(b_fc, jnp.float32),
                     (0, O_pad - O)).reshape(1, O_pad)                # (1,Op)

    kernel = partial(lstm_predictor_kernel,
                     seq_len=T, chunk_len=Tc, batch_shard=B_shard,
                     hidden_pad=Hp, input_size=I)

    rows = Tc * B_shard
    full = lambda s, j: (0, 0)
    grid_spec = pltpu.PrefetchScalarGridSpec(
        num_scalar_prefetch=0,
        grid=(num_shards, num_chunks),
        in_specs=[
            pl.BlockSpec((rows, I), lambda s, j: (s * num_chunks + j, 0)),
            pl.BlockSpec((I, 4 * Hp), full),
            pl.BlockSpec((Hp, 4 * Hp), full),
            pl.BlockSpec((1, 4 * Hp), full),
            pl.BlockSpec((Hp, O_pad), full),
            pl.BlockSpec((1, O_pad), full),
        ],
        out_specs=pl.BlockSpec((B_shard, O_pad), lambda s, j: (s, 0)),
        scratch_shapes=[
            pltpu.VMEM((rows, 4 * Hp), jnp.float32),   # gx (input projection)
            pltpu.VMEM((B_shard, Hp), jnp.float32),    # h (persistent state)
            pltpu.VMEM((B_shard, Hp), jnp.float32),    # c (persistent state)
        ],
    )

    # VMEM budget sized to the real footprint (headroom for double-buffering).
    est = (2 * rows * _round_up(I, 128) * 4            # x blocks (2-buffered)
           + rows * 4 * Hp * 4                          # gx scratch
           + 2 * B_shard * Hp * 4                       # h, c
           + 2 * (_round_up(I, 8) * 4 * Hp + Hp * 4 * Hp
                  + Hp * O_pad + 2 * 4 * Hp + O_pad) * 4  # weights / biases
           + 2 * B_shard * O_pad * 4)                   # out block
    vmem_limit = int(min(48 * 1024 * 1024, max(16 * 1024 * 1024, 2 * est)))

    out_pad = pl.pallas_call(
        kernel,
        out_shape=jax.ShapeDtypeStruct((B_pad, O_pad), jnp.float32),
        grid_spec=grid_spec,
        compiler_params=pltpu.CompilerParams(
            dimension_semantics=("parallel", "arbitrary"),
            vmem_limit_bytes=vmem_limit),
    )(x_2d, w_ih_t, w_hh_t, b, w_fc_t, b_fc_p)

    return out_pad[:B, :O]


def lstm_predictor_ref(x, w_ih, w_hh, b_ih, b_hh, w_fc, b_fc):
    """Pure-JAX reference matching torch.nn.LSTM(batch_first=True) + Linear."""
    B, T, I = x.shape
    H = w_hh.shape[1]

    def step(carry, x_t):
        h, c = carry
        gates = x_t @ w_ih.T + h @ w_hh.T + b_ih + b_hh
        i = jax.nn.sigmoid(gates[:, 0:H])
        f = jax.nn.sigmoid(gates[:, H:2 * H])
        g = jnp.tanh(gates[:, 2 * H:3 * H])
        o = jax.nn.sigmoid(gates[:, 3 * H:4 * H])
        c = f * c + i * g
        h = o * jnp.tanh(c)
        return (h, c), None

    h0 = jnp.zeros((B, H), jnp.float32)
    c0 = jnp.zeros((B, H), jnp.float32)
    (h, _), _ = jax.lax.scan(step, (h0, c0), jnp.transpose(x, (1, 0, 2)))
    return h @ w_fc.T + b_fc


if __name__ == "__main__":
    B, T, I, H = 2, 8, 4, 32   # batch, seq, input_size, hidden_size

    key = jax.random.PRNGKey(0)
    k1, k2, k3, k4, k5, k6, k7 = jax.random.split(key, 7)
    bound = 1.0 / jnp.sqrt(H)   # PyTorch default LSTM/Linear init scale

    x = jax.random.normal(k1, (B, T, I), jnp.float32)
    w_ih = jax.random.uniform(k2, (4 * H, I), jnp.float32, -bound, bound)
    w_hh = jax.random.uniform(k3, (4 * H, H), jnp.float32, -bound, bound)
    b_ih = jax.random.uniform(k4, (4 * H,), jnp.float32, -bound, bound)
    b_hh = jax.random.uniform(k5, (4 * H,), jnp.float32, -bound, bound)
    w_fc = jax.random.uniform(k6, (I, H), jnp.float32, -bound, bound)
    b_fc = jax.random.uniform(k7, (I,), jnp.float32, -bound, bound)

    out = lstm_predictor(x, w_ih, w_hh, b_ih, b_hh, w_fc, b_fc)
    out = jax.block_until_ready(out)

    ref = lstm_predictor_ref(x, w_ih, w_hh, b_ih, b_hh, w_fc, b_fc)
    assert out.shape == (B, I)
    assert jnp.allclose(out, ref, atol=1e-5, rtol=1e-5), (out, ref)

    print("KERNEL_OK")
</pallas_src>

<mosaic_0001>
module attributes {stable_mosaic.version = 11 : i64} {
  func.func @lstm_predictor_kernel(%arg0: i32, %arg1: i32, %arg2: memref<64x4xf32, #tpu.memory_space<vmem>>, %arg3: memref<4x512xf32, #tpu.memory_space<vmem>>, %arg4: memref<128x512xf32, #tpu.memory_space<vmem>>, %arg5: memref<1x512xf32, #tpu.memory_space<vmem>>, %arg6: memref<128x128xf32, #tpu.memory_space<vmem>>, %arg7: memref<1x128xf32, #tpu.memory_space<vmem>>, %arg8: memref<8x128xf32, #tpu.memory_space<vmem>>, %arg9: memref<64x512xf32, #tpu.memory_space<vmem>>, %arg10: memref<8x128xf32, #tpu.memory_space<vmem>>, %arg11: memref<8x128xf32, #tpu.memory_space<vmem>>) attributes {dimension_semantics = [#tpu.dimension_semantics<parallel>, #tpu.dimension_semantics<arbitrary>], iteration_bounds = array<i64: 1, 1>, scalar_prefetch = 0 : i64, scratch_operands = 3 : i64, tpu.core_type = #tpu.core_type<tc>, window_params = [{transform_indices = @transform_0, window_bounds = array<i64: 64, 4>}, {pipeline_mode = #tpu.pipeline_mode<synchronous>, transform_indices = @transform_1, window_bounds = array<i64: 4, 512>}, {pipeline_mode = #tpu.pipeline_mode<synchronous>, transform_indices = @transform_2, window_bounds = array<i64: 128, 512>}, {pipeline_mode = #tpu.pipeline_mode<synchronous>, transform_indices = @transform_3, window_bounds = array<i64: 1, 512>}, {pipeline_mode = #tpu.pipeline_mode<synchronous>, transform_indices = @transform_4, window_bounds = array<i64: 128, 128>}, {pipeline_mode = #tpu.pipeline_mode<synchronous>, transform_indices = @transform_5, window_bounds = array<i64: 1, 128>}, {transform_indices = @transform_6, window_bounds = array<i64: 8, 128>}]} {
    %c0_i32 = arith.constant 0 : i32
    %0 = arith.cmpi eq, %arg1, %c0_i32 : i32
    %1 = arith.extui %0 : i1 to i32
    %c0_i32_0 = arith.constant 0 : i32
    %2 = arith.cmpi ne, %1, %c0_i32_0 : i32
    scf.if %2 {
      %cst_76 = arith.constant 0.000000e+00 : f32
      %240 = vector.broadcast %cst_76 : f32 to vector<8x128xf32>
      %c0_77 = arith.constant 0 : index
      %c0_78 = arith.constant 0 : index
      %241 = vector.load %arg10[%c0_77, %c0_78] : memref<8x128xf32, #tpu.memory_space<vmem>>, vector<8x128xf32>
      tpu.vector_store %arg10[%c0_77, %c0_78], %240 {strides = array<i32>} : memref<8x128xf32, #tpu.memory_space<vmem>>, vector<8x128xf32>,
      %cst_79 = arith.constant 0.000000e+00 : f32
      %242 = vector.broadcast %cst_79 : f32 to vector<8x128xf32>
      %c0_80 = arith.constant 0 : index
      %c0_81 = arith.constant 0 : index
      %243 = vector.load %arg11[%c0_80, %c0_81] : memref<8x128xf32, #tpu.memory_space<vmem>>, vector<8x128xf32>
      tpu.vector_store %arg11[%c0_80, %c0_81], %242 {strides = array<i32>} : memref<8x128xf32, #tpu.memory_space<vmem>>, vector<8x128xf32>,
    } else {
    }
    %c0 = arith.constant 0 : index
    %c0_1 = arith.constant 0 : index
    %3 = vector.load %arg2[%c0, %c0_1] : memref<64x4xf32, #tpu.memory_space<vmem>>, vector<64x4xf32>
    %c0_2 = arith.constant 0 : index
    %c0_3 = arith.constant 0 : index
    %4 = vector.load %arg3[%c0_2, %c0_3] : memref<4x512xf32, #tpu.memory_space<vmem>>, vector<4x512xf32>
    %5 = vector.extract_strided_slice %3 {offsets = [0, 0], sizes = [64, 1], strides = [1, 1]} : vector<64x4xf32> to vector<64x1xf32>
    %6 = vector.extract_strided_slice %4 {offsets = [0, 0], sizes = [1, 512], strides = [1, 1]} : vector<4x512xf32> to vector<1x512xf32>
    %7 = vector.broadcast %5 : vector<64x1xf32> to vector<64x512xf32>
    %8 = vector.broadcast %6 : vector<1x512xf32> to vector<64x512xf32>
    %9 = arith.mulf %7, %8 : vector<64x512xf32>
    %10 = vector.extract_strided_slice %3 {offsets = [0, 1], sizes = [64, 1], strides = [1, 1]} : vector<64x4xf32> to vector<64x1xf32>
    %11 = vector.extract_strided_slice %4 {offsets = [1, 0], sizes = [1, 512], strides = [1, 1]} : vector<4x512xf32> to vector<1x512xf32>
    %12 = vector.broadcast %10 : vector<64x1xf32> to vector<64x512xf32>
    %13 = vector.broadcast %11 : vector<1x512xf32> to vector<64x512xf32>
    %14 = arith.mulf %12, %13 : vector<64x512xf32>
    %15 = arith.addf %9, %14 : vector<64x512xf32>
    %16 = vector.extract_strided_slice %3 {offsets = [0, 2], sizes = [64, 1], strides = [1, 1]} : vector<64x4xf32> to vector<64x1xf32>
    %17 = vector.extract_strided_slice %4 {offsets = [2, 0], sizes = [1, 512], strides = [1, 1]} : vector<4x512xf32> to vector<1x512xf32>
    %18 = vector.broadcast %16 : vector<64x1xf32> to vector<64x512xf32>
    %19 = vector.broadcast %17 : vector<1x512xf32> to vector<64x512xf32>
    %20 = arith.mulf %18, %19 : vector<64x512xf32>
    %21 = arith.addf %15, %20 : vector<64x512xf32>
    %22 = vector.extract_strided_slice %3 {offsets = [0, 3], sizes = [64, 1], strides = [1, 1]} : vector<64x4xf32> to vector<64x1xf32>
    %23 = vector.extract_strided_slice %4 {offsets = [3, 0], sizes = [1, 512], strides = [1, 1]} : vector<4x512xf32> to vector<1x512xf32>
    %24 = vector.broadcast %22 : vector<64x1xf32> to vector<64x512xf32>
    %25 = vector.broadcast %23 : vector<1x512xf32> to vector<64x512xf32>
    %26 = arith.mulf %24, %25 : vector<64x512xf32>
    %27 = arith.addf %21, %26 : vector<64x512xf32>
    %c0_4 = arith.constant 0 : index
    %c0_5 = arith.constant 0 : index
    %28 = vector.load %arg5[%c0_4, %c0_5] : memref<1x512xf32, #tpu.memory_space<vmem>>, vector<1x512xf32>
    %29 = vector.broadcast %28 : vector<1x512xf32> to vector<64x512xf32>
    %30 = arith.addf %27, %29 : vector<64x512xf32>
    %c0_6 = arith.constant 0 : index
    %c0_7 = arith.constant 0 : index
    %31 = vector.load %arg9[%c0_6, %c0_7] : memref<64x512xf32, #tpu.memory_space<vmem>>, vector<64x512xf32>
    tpu.vector_store %arg9[%c0_6, %c0_7], %30 {strides = array<i32>} : memref<64x512xf32, #tpu.memory_space<vmem>>, vector<64x512xf32>,
    %c0_8 = arith.constant 0 : index
    %c0_9 = arith.constant 0 : index
    %32 = vector.load %arg4[%c0_8, %c0_9] : memref<128x512xf32, #tpu.memory_space<vmem>>, vector<128x512xf32>
    %c0_10 = arith.constant 0 : index
    %c0_11 = arith.constant 0 : index
    %33 = vector.load %arg10[%c0_10, %c0_11] : memref<8x128xf32, #tpu.memory_space<vmem>>, vector<8x128xf32>
    %c0_12 = arith.constant 0 : index
    %c0_13 = arith.constant 0 : index
    %34 = vector.load %arg11[%c0_12, %c0_13] : memref<8x128xf32, #tpu.memory_space<vmem>>, vector<8x128xf32>
    %c0_i32_14 = arith.constant 0 : i32
    %c8_i32 = arith.constant 8 : i32
    %35 = arith.muli %c0_i32_14, %c8_i32 : i32
    %36 = tpu.assume_multiple %35, 8 : i32
    %37 = arith.index_cast %36 : i32 to index
    %c0_15 = arith.constant 0 : index
    %38 = vector.load %arg9[%37, %c0_15] : memref<64x512xf32, #tpu.memory_space<vmem>>, vector<8x512xf32>
    %cst = arith.constant dense<0.000000e+00> : vector<8x512xf32>
    %39 = tpu.matmul %33, %32, %cst {dimension_numbers = #tpu.dot_dimension_numbers<[1], [0], [0], [1], [0, 0, 1, 1], [], []>} : vector<8x128xf32>, vector<128x512xf32>, vector<8x512xf32> -> vector<8x512xf32>
    %40 = arith.addf %38, %39 : vector<8x512xf32>
    %41 = math.tanh %40 : vector<8x512xf32>
    %42 = vector.extract_strided_slice %41 {offsets = [0, 0], sizes = [8, 256], strides = [1, 1]} : vector<8x512xf32> to vector<8x256xf32>
    %cst_16 = arith.constant 5.000000e-01 : f32
    %43 = vector.broadcast %cst_16 : f32 to vector<8x256xf32>
    %44 = arith.mulf %42, %43 : vector<8x256xf32>
    %cst_17 = arith.constant 5.000000e-01 : f32
    %45 = vector.broadcast %cst_17 : f32 to vector<8x256xf32>
    %46 = arith.addf %44, %45 : vector<8x256xf32>
    %47 = vector.extract_strided_slice %41 {offsets = [0, 256], sizes = [8, 128], strides = [1, 1]} : vector<8x512xf32> to vector<8x128xf32>
    %48 = vector.extract_strided_slice %41 {offsets = [0, 384], sizes = [8, 128], strides = [1, 1]} : vector<8x512xf32> to vector<8x128xf32>
    %cst_18 = arith.constant 5.000000e-01 : f32
    %49 = vector.broadcast %cst_18 : f32 to vector<8x128xf32>
    %50 = arith.mulf %48, %49 : vector<8x128xf32>
    %cst_19 = arith.constant 5.000000e-01 : f32
    %51 = vector.broadcast %cst_19 : f32 to vector<8x128xf32>
    %52 = arith.addf %50, %51 : vector<8x128xf32>
    %53 = vector.extract_strided_slice %46 {offsets = [0, 0], sizes = [8, 128], strides = [1, 1]} : vector<8x256xf32> to vector<8x128xf32>
    %54 = vector.extract_strided_slice %46 {offsets = [0, 128], sizes = [8, 128], strides = [1, 1]} : vector<8x256xf32> to vector<8x128xf32>
    %55 = arith.mulf %54, %34 : vector<8x128xf32>
    %56 = arith.mulf %53, %47 : vector<8x128xf32>
    %57 = arith.addf %55, %56 : vector<8x128xf32>
    %58 = math.tanh %57 : vector<8x128xf32>
    %59 = arith.mulf %52, %58 : vector<8x128xf32>
    %c1_i32 = arith.constant 1 : i32
    %c8_i32_20 = arith.constant 8 : i32
    %60 = arith.muli %c1_i32, %c8_i32_20 : i32
    %61 = tpu.assume_multiple %60, 8 : i32
    %62 = arith.index_cast %61 : i32 to index
    %c0_21 = arith.constant 0 : index
    %63 = vector.load %arg9[%62, %c0_21] : memref<64x512xf32, #tpu.memory_space<vmem>>, vector<8x512xf32>
    %cst_22 = arith.constant dense<0.000000e+00> : vector<8x512xf32>
    %64 = tpu.matmul %59, %32, %cst_22 {dimension_numbers = #tpu.dot_dimension_numbers<[1], [0], [0], [1], [0, 0, 1, 1], [], []>} : vector<8x128xf32>, vector<128x512xf32>, vector<8x512xf32> -> vector<8x512xf32>
    %65 = arith.addf %63, %64 : vector<8x512xf32>
    %66 = math.tanh %65 : vector<8x512xf32>
    %67 = vector.extract_strided_slice %66 {offsets = [0, 0], sizes = [8, 256], strides = [1, 1]} : vector<8x512xf32> to vector<8x256xf32>
    %cst_23 = arith.constant 5.000000e-01 : f32
    %68 = vector.broadcast %cst_23 : f32 to vector<8x256xf32>
    %69 = arith.mulf %67, %68 : vector<8x256xf32>
    %cst_24 = arith.constant 5.000000e-01 : f32
    %70 = vector.broadcast %cst_24 : f32 to vector<8x256xf32>
    %71 = arith.addf %69, %70 : vector<8x256xf32>
    %72 = vector.extract_strided_slice %66 {offsets = [0, 256], sizes = [8, 128], strides = [1, 1]} : vector<8x512xf32> to vector<8x128xf32>
    %73 = vector.extract_strided_slice %66 {offsets = [0, 384], sizes = [8, 128], strides = [1, 1]} : vector<8x512xf32> to vector<8x128xf32>
    %cst_25 = arith.constant 5.000000e-01 : f32
    %74 = vector.broadcast %cst_25 : f32 to vector<8x128xf32>
    %75 = arith.mulf %73, %74 : vector<8x128xf32>
    %cst_26 = arith.constant 5.000000e-01 : f32
    %76 = vector.broadcast %cst_26 : f32 to vector<8x128xf32>
    %77 = arith.addf %75, %76 : vector<8x128xf32>
    %78 = vector.extract_strided_slice %71 {offsets = [0, 0], sizes = [8, 128], strides = [1, 1]} : vector<8x256xf32> to vector<8x128xf32>
    %79 = vector.extract_strided_slice %71 {offsets = [0, 128], sizes = [8, 128], strides = [1, 1]} : vector<8x256xf32> to vector<8x128xf32>
    %80 = arith.mulf %79, %57 : vector<8x128xf32>
    %81 = arith.mulf %78, %72 : vector<8x128xf32>
    %82 = arith.addf %80, %81 : vector<8x128xf32>
    %83 = math.tanh %82 : vector<8x128xf32>
    %84 = arith.mulf %77, %83 : vector<8x128xf32>
    %c2_i32 = arith.constant 2 : i32
    %c8_i32_27 = arith.constant 8 : i32
    %85 = arith.muli %c2_i32, %c8_i32_27 : i32
    %86 = tpu.assume_multiple %85, 8 : i32
    %87 = arith.index_cast %86 : i32 to index
    %c0_28 = arith.constant 0 : index
    %88 = vector.load %arg9[%87, %c0_28] : memref<64x512xf32, #tpu.memory_space<vmem>>, vector<8x512xf32>
    %cst_29 = arith.constant dense<0.000000e+00> : vector<8x512xf32>
    %89 = tpu.matmul %84, %32, %cst_29 {dimension_numbers = #tpu.dot_dimension_numbers<[1], [0], [0], [1], [0, 0, 1, 1], [], []>} : vector<8x128xf32>, vector<128x512xf32>, vector<8x512xf32> -> vector<8x512xf32>
    %90 = arith.addf %88, %89 : vector<8x512xf32>
    %91 = math.tanh %90 : vector<8x512xf32>
    %92 = vector.extract_strided_slice %91 {offsets = [0, 0], sizes = [8, 256], strides = [1, 1]} : vector<8x512xf32> to vector<8x256xf32>
    %cst_30 = arith.constant 5.000000e-01 : f32
    %93 = vector.broadcast %cst_30 : f32 to vector<8x256xf32>
    %94 = arith.mulf %92, %93 : vector<8x256xf32>
    %cst_31 = arith.constant 5.000000e-01 : f32
    %95 = vector.broadcast %cst_31 : f32 to vector<8x256xf32>
    %96 = arith.addf %94, %95 : vector<8x256xf32>
    %97 = vector.extract_strided_slice %91 {offsets = [0, 256], sizes = [8, 128], strides = [1, 1]} : vector<8x512xf32> to vector<8x128xf32>
    %98 = vector.extract_strided_slice %91 {offsets = [0, 384], sizes = [8, 128], strides = [1, 1]} : vector<8x512xf32> to vector<8x128xf32>
    %cst_32 = arith.constant 5.000000e-01 : f32
    %99 = vector.broadcast %cst_32 : f32 to vector<8x128xf32>
    %100 = arith.mulf %98, %99 : vector<8x128xf32>
    %cst_33 = arith.constant 5.000000e-01 : f32
    %101 = vector.broadcast %cst_33 : f32 to vector<8x128xf32>
    %102 = arith.addf %100, %101 : vector<8x128xf32>
    %103 = vector.extract_strided_slice %96 {offsets = [0, 0], sizes = [8, 128], strides = [1, 1]} : vector<8x256xf32> to vector<8x128xf32>
    %104 = vector.extract_strided_slice %96 {offsets = [0, 128], sizes = [8, 128], strides = [1, 1]} : vector<8x256xf32> to vector<8x128xf32>
    %105 = arith.mulf %104, %82 : vector<8x128xf32>
    %106 = arith.mulf %103, %97 : vector<8x128xf32>
    %107 = arith.addf %105, %106 : vector<8x128xf32>
    %108 = math.tanh %107 : vector<8x128xf32>
    %109 = arith.mulf %102, %108 : vector<8x128xf32>
    %c3_i32 = arith.constant 3 : i32
    %c8_i32_34 = arith.constant 8 : i32
    %110 = arith.muli %c3_i32, %c8_i32_34 : i32
    %111 = tpu.assume_multiple %110, 8 : i32
    %112 = arith.index_cast %111 : i32 to index
    %c0_35 = arith.constant 0 : index
    %113 = vector.load %arg9[%112, %c0_35] : memref<64x512xf32, #tpu.memory_space<vmem>>, vector<8x512xf32>
    %cst_36 = arith.constant dense<0.000000e+00> : vector<8x512xf32>
    %114 = tpu.matmul %109, %32, %cst_36 {dimension_numbers = #tpu.dot_dimension_numbers<[1], [0], [0], [1], [0, 0, 1, 1], [], []>} : vector<8x128xf32>, vector<128x512xf32>, vector<8x512xf32> -> vector<8x512xf32>
    %115 = arith.addf %113, %114 : vector<8x512xf32>
    %116 = math.tanh %115 : vector<8x512xf32>
    %117 = vector.extract_strided_slice %116 {offsets = [0, 0], sizes = [8, 256], strides = [1, 1]} : vector<8x512xf32> to vector<8x256xf32>
    %cst_37 = arith.constant 5.000000e-01 : f32
    %118 = vector.broadcast %cst_37 : f32 to vector<8x256xf32>
    %119 = arith.mulf %117, %118 : vector<8x256xf32>
    %cst_38 = arith.constant 5.000000e-01 : f32
    %120 = vector.broadcast %cst_38 : f32 to vector<8x256xf32>
    %121 = arith.addf %119, %120 : vector<8x256xf32>
    %122 = vector.extract_strided_slice %116 {offsets = [0, 256], sizes = [8, 128], strides = [1, 1]} : vector<8x512xf32> to vector<8x128xf32>
    %123 = vector.extract_strided_slice %116 {offsets = [0, 384], sizes = [8, 128], strides = [1, 1]} : vector<8x512xf32> to vector<8x128xf32>
    %cst_39 = arith.constant 5.000000e-01 : f32
    %124 = vector.broadcast %cst_39 : f32 to vector<8x128xf32>
    %125 = arith.mulf %123, %124 : vector<8x128xf32>
    %cst_40 = arith.constant 5.000000e-01 : f32
    %126 = vector.broadcast %cst_40 : f32 to vector<8x128xf32>
    %127 = arith.addf %125, %126 : vector<8x128xf32>
    %128 = vector.extract_strided_slice %121 {offsets = [0, 0], sizes = [8, 128], strides = [1, 1]} : vector<8x256xf32> to vector<8x128xf32>
    %129 = vector.extract_strided_slice %121 {offsets = [0, 128], sizes = [8, 128], strides = [1, 1]} : vector<8x256xf32> to vector<8x128xf32>
    %130 = arith.mulf %129, %107 : vector<8x128xf32>
    %131 = arith.mulf %128, %122 : vector<8x128xf32>
    %132 = arith.addf %130, %131 : vector<8x128xf32>
    %133 = math.tanh %132 : vector<8x128xf32>
    %134 = arith.mulf %127, %133 : vector<8x128xf32>
    %c4_i32 = arith.constant 4 : i32
    %c8_i32_41 = arith.constant 8 : i32
    %135 = arith.muli %c4_i32, %c8_i32_41 : i32
    %136 = tpu.assume_multiple %135, 8 : i32
    %137 = arith.index_cast %136 : i32 to index
    %c0_42 = arith.constant 0 : index
    %138 = vector.load %arg9[%137, %c0_42] : memref<64x512xf32, #tpu.memory_space<vmem>>, vector<8x512xf32>
    %cst_43 = arith.constant dense<0.000000e+00> : vector<8x512xf32>
    %139 = tpu.matmul %134, %32, %cst_43 {dimension_numbers = #tpu.dot_dimension_numbers<[1], [0], [0], [1], [0, 0, 1, 1], [], []>} : vector<8x128xf32>, vector<128x512xf32>, vector<8x512xf32> -> vector<8x512xf32>
    %140 = arith.addf %138, %139 : vector<8x512xf32>
    %141 = math.tanh %140 : vector<8x512xf32>
    %142 = vector.extract_strided_slice %141 {offsets = [0, 0], sizes = [8, 256], strides = [1, 1]} : vector<8x512xf32> to vector<8x256xf32>
    %cst_44 = arith.constant 5.000000e-01 : f32
    %143 = vector.broadcast %cst_44 : f32 to vector<8x256xf32>
    %144 = arith.mulf %142, %143 : vector<8x256xf32>
    %cst_45 = arith.constant 5.000000e-01 : f32
    %145 = vector.broadcast %cst_45 : f32 to vector<8x256xf32>
    %146 = arith.addf %144, %145 : vector<8x256xf32>
    %147 = vector.extract_strided_slice %141 {offsets = [0, 256], sizes = [8, 128], strides = [1, 1]} : vector<8x512xf32> to vector<8x128xf32>
    %148 = vector.extract_strided_slice %141 {offsets = [0, 384], sizes = [8, 128], strides = [1, 1]} : vector<8x512xf32> to vector<8x128xf32>
    %cst_46 = arith.constant 5.000000e-01 : f32
    %149 = vector.broadcast %cst_46 : f32 to vector<8x128xf32>
    %150 = arith.mulf %148, %149 : vector<8x128xf32>
    %cst_47 = arith.constant 5.000000e-01 : f32
    %151 = vector.broadcast %cst_47 : f32 to vector<8x128xf32>
    %152 = arith.addf %150, %151 : vector<8x128xf32>
    %153 = vector.extract_strided_slice %146 {offsets = [0, 0], sizes = [8, 128], strides = [1, 1]} : vector<8x256xf32> to vector<8x128xf32>
    %154 = vector.extract_strided_slice %146 {offsets = [0, 128], sizes = [8, 128], strides = [1, 1]} : vector<8x256xf32> to vector<8x128xf32>
    %155 = arith.mulf %154, %132 : vector<8x128xf32>
    %156 = arith.mulf %153, %147 : vector<8x128xf32>
    %157 = arith.addf %155, %156 : vector<8x128xf32>
    %158 = math.tanh %157 : vector<8x128xf32>
    %159 = arith.mulf %152, %158 : vector<8x128xf32>
    %c5_i32 = arith.constant 5 : i32
    %c8_i32_48 = arith.constant 8 : i32
    %160 = arith.muli %c5_i32, %c8_i32_48 : i32
    %161 = tpu.assume_multiple %160, 8 : i32
    %162 = arith.index_cast %161 : i32 to index
    %c0_49 = arith.constant 0 : index
    %163 = vector.load %arg9[%162, %c0_49] : memref<64x512xf32, #tpu.memory_space<vmem>>, vector<8x512xf32>
    %cst_50 = arith.constant dense<0.000000e+00> : vector<8x512xf32>
    %164 = tpu.matmul %159, %32, %cst_50 {dimension_numbers = #tpu.dot_dimension_numbers<[1], [0], [0], [1], [0, 0, 1, 1], [], []>} : vector<8x128xf32>, vector<128x512xf32>, vector<8x512xf32> -> vector<8x512xf32>
    %165 = arith.addf %163, %164 : vector<8x512xf32>
    %166 = math.tanh %165 : vector<8x512xf32>
    %167 = vector.extract_strided_slice %166 {offsets = [0, 0], sizes = [8, 256], strides = [1, 1]} : vector<8x512xf32> to vector<8x256xf32>
    %cst_51 = arith.constant 5.000000e-01 : f32
    %168 = vector.broadcast %cst_51 : f32 to vector<8x256xf32>
    %169 = arith.mulf %167, %168 : vector<8x256xf32>
    %cst_52 = arith.constant 5.000000e-01 : f32
    %170 = vector.broadcast %cst_52 : f32 to vector<8x256xf32>
    %171 = arith.addf %169, %170 : vector<8x256xf32>
    %172 = vector.extract_strided_slice %166 {offsets = [0, 256], sizes = [8, 128], strides = [1, 1]} : vector<8x512xf32> to vector<8x128xf32>
    %173 = vector.extract_strided_slice %166 {offsets = [0, 384], sizes = [8, 128], strides = [1, 1]} : vector<8x512xf32> to vector<8x128xf32>
    %cst_53 = arith.constant 5.000000e-01 : f32
    %174 = vector.broadcast %cst_53 : f32 to vector<8x128xf32>
    %175 = arith.mulf %173, %174 : vector<8x128xf32>
    %cst_54 = arith.constant 5.000000e-01 : f32
    %176 = vector.broadcast %cst_54 : f32 to vector<8x128xf32>
    %177 = arith.addf %175, %176 : vector<8x128xf32>
    %178 = vector.extract_strided_slice %171 {offsets = [0, 0], sizes = [8, 128], strides = [1, 1]} : vector<8x256xf32> to vector<8x128xf32>
    %179 = vector.extract_strided_slice %171 {offsets = [0, 128], sizes = [8, 128], strides = [1, 1]} : vector<8x256xf32> to vector<8x128xf32>
    %180 = arith.mulf %179, %157 : vector<8x128xf32>
    %181 = arith.mulf %178, %172 : vector<8x128xf32>
    %182 = arith.addf %180, %181 : vector<8x128xf32>
    %183 = math.tanh %182 : vector<8x128xf32>
    %184 = arith.mulf %177, %183 : vector<8x128xf32>
    %c6_i32 = arith.constant 6 : i32
    %c8_i32_55 = arith.constant 8 : i32
    %185 = arith.muli %c6_i32, %c8_i32_55 : i32
    %186 = tpu.assume_multiple %185, 8 : i32
    %187 = arith.index_cast %186 : i32 to index
    %c0_56 = arith.constant 0 : index
    %188 = vector.load %arg9[%187, %c0_56] : memref<64x512xf32, #tpu.memory_space<vmem>>, vector<8x512xf32>
    %cst_57 = arith.constant dense<0.000000e+00> : vector<8x512xf32>
    %189 = tpu.matmul %184, %32, %cst_57 {dimension_numbers = #tpu.dot_dimension_numbers<[1], [0], [0], [1], [0, 0, 1, 1], [], []>} : vector<8x128xf32>, vector<128x512xf32>, vector<8x512xf32> -> vector<8x512xf32>
    %190 = arith.addf %188, %189 : vector<8x512xf32>
    %191 = math.tanh %190 : vector<8x512xf32>
    %192 = vector.extract_strided_slice %191 {offsets = [0, 0], sizes = [8, 256], strides = [1, 1]} : vector<8x512xf32> to vector<8x256xf32>
    %cst_58 = arith.constant 5.000000e-01 : f32
    %193 = vector.broadcast %cst_58 : f32 to vector<8x256xf32>
    %194 = arith.mulf %192, %193 : vector<8x256xf32>
    %cst_59 = arith.constant 5.000000e-01 : f32
    %195 = vector.broadcast %cst_59 : f32 to vector<8x256xf32>
    %196 = arith.addf %194, %195 : vector<8x256xf32>
    %197 = vector.extract_strided_slice %191 {offsets = [0, 256], sizes = [8, 128], strides = [1, 1]} : vector<8x512xf32> to vector<8x128xf32>
    %198 = vector.extract_strided_slice %191 {offsets = [0, 384], sizes = [8, 128], strides = [1, 1]} : vector<8x512xf32> to vector<8x128xf32>
    %cst_60 = arith.constant 5.000000e-01 : f32
    %199 = vector.broadcast %cst_60 : f32 to vector<8x128xf32>
    %200 = arith.mulf %198, %199 : vector<8x128xf32>
    %cst_61 = arith.constant 5.000000e-01 : f32
    %201 = vector.broadcast %cst_61 : f32 to vector<8x128xf32>
    %202 = arith.addf %200, %201 : vector<8x128xf32>
    %203 = vector.extract_strided_slice %196 {offsets = [0, 0], sizes = [8, 128], strides = [1, 1]} : vector<8x256xf32> to vector<8x128xf32>
    %204 = vector.extract_strided_slice %196 {offsets = [0, 128], sizes = [8, 128], strides = [1, 1]} : vector<8x256xf32> to vector<8x128xf32>
    %205 = arith.mulf %204, %182 : vector<8x128xf32>
    %206 = arith.mulf %203, %197 : vector<8x128xf32>
    %207 = arith.addf %205, %206 : vector<8x128xf32>
    %208 = math.tanh %207 : vector<8x128xf32>
    %209 = arith.mulf %202, %208 : vector<8x128xf32>
    %c7_i32 = arith.constant 7 : i32
    %c8_i32_62 = arith.constant 8 : i32
    %210 = arith.muli %c7_i32, %c8_i32_62 : i32
    %211 = tpu.assume_multiple %210, 8 : i32
    %212 = arith.index_cast %211 : i32 to index
    %c0_63 = arith.constant 0 : index
    %213 = vector.load %arg9[%212, %c0_63] : memref<64x512xf32, #tpu.memory_space<vmem>>, vector<8x512xf32>
    %cst_64 = arith.constant dense<0.000000e+00> : vector<8x512xf32>
    %214 = tpu.matmul %209, %32, %cst_64 {dimension_numbers = #tpu.dot_dimension_numbers<[1], [0], [0], [1], [0, 0, 1, 1], [], []>} : vector<8x128xf32>, vector<128x512xf32>, vector<8x512xf32> -> vector<8x512xf32>
    %215 = arith.addf %213, %214 : vector<8x512xf32>
    %216 = math.tanh %215 : vector<8x512xf32>
    %217 = vector.extract_strided_slice %216 {offsets = [0, 0], sizes = [8, 256], strides = [1, 1]} : vector<8x512xf32> to vector<8x256xf32>
    %cst_65 = arith.constant 5.000000e-01 : f32
    %218 = vector.broadcast %cst_65 : f32 to vector<8x256xf32>
    %219 = arith.mulf %217, %218 : vector<8x256xf32>
    %cst_66 = arith.constant 5.000000e-01 : f32
    %220 = vector.broadcast %cst_66 : f32 to vector<8x256xf32>
    %221 = arith.addf %219, %220 : vector<8x256xf32>
    %222 = vector.extract_strided_slice %216 {offsets = [0, 256], sizes = [8, 128], strides = [1, 1]} : vector<8x512xf32> to vector<8x128xf32>
    %223 = vector.extract_strided_slice %216 {offsets = [0, 384], sizes = [8, 128], strides = [1, 1]} : vector<8x512xf32> to vector<8x128xf32>
    %cst_67 = arith.constant 5.000000e-01 : f32
    %224 = vector.broadcast %cst_67 : f32 to vector<8x128xf32>
    %225 = arith.mulf %223, %224 : vector<8x128xf32>
    %cst_68 = arith.constant 5.000000e-01 : f32
    %226 = vector.broadcast %cst_68 : f32 to vector<8x128xf32>
    %227 = arith.addf %225, %226 : vector<8x128xf32>
    %228 = vector.extract_strided_slice %221 {offsets = [0, 0], sizes = [8, 128], strides = [1, 1]} : vector<8x256xf32> to vector<8x128xf32>
    %229 = vector.extract_strided_slice %221 {offsets = [0, 128], sizes = [8, 128], strides = [1, 1]} : vector<8x256xf32> to vector<8x128xf32>
    %230 = arith.mulf %229, %207 : vector<8x128xf32>
    %231 = arith.mulf %228, %222 : vector<8x128xf32>
    %232 = arith.addf %230, %231 : vector<8x128xf32>
    %233 = math.tanh %232 : vector<8x128xf32>
    %234 = arith.mulf %227, %233 : vector<8x128xf32>
    %c8_i32_69 = arith.constant 8 : i32
    %c0_70 = arith.constant 0 : index
    %c0_71 = arith.constant 0 : index
    %235 = vector.load %arg10[%c0_70, %c0_71] : memref<8x128xf32, #tpu.memory_space<vmem>>, vector<8x128xf32>
    tpu.vector_store %arg10[%c0_70, %c0_71], %234 {strides = array<i32>} : memref<8x128xf32, #tpu.memory_space<vmem>>, vector<8x128xf32>,
    %c0_72 = arith.constant 0 : index
    %c0_73 = arith.constant 0 : index
    %236 = vector.load %arg11[%c0_72, %c0_73] : memref<8x128xf32, #tpu.memory_space<vmem>>, vector<8x128xf32>
    tpu.vector_store %arg11[%c0_72, %c0_73], %232 {strides = array<i32>} : memref<8x128xf32, #tpu.memory_space<vmem>>, vector<8x128xf32>,
    %c0_i32_74 = arith.constant 0 : i32
    %237 = arith.cmpi eq, %arg1, %c0_i32_74 : i32
    %238 = arith.extui %237 : i1 to i32
    %c0_i32_75 = arith.constant 0 : i32
    %239 = arith.cmpi ne, %238, %c0_i32_75 : i32
    scf.if %239 {
      %c0_76 = arith.constant 0 : index
      %c0_77 = arith.constant 0 : index
      %240 = vector.load %arg6[%c0_76, %c0_77] : memref<128x128xf32, #tpu.memory_space<vmem>>, vector<128x128xf32>
      %cst_78 = arith.constant dense<0.000000e+00> : vector<8x128xf32>
      %241 = tpu.matmul %234, %240, %cst_78 {dimension_numbers = #tpu.dot_dimension_numbers<[1], [0], [0], [1], [0, 0, 1, 1], [], []>} : vector<8x128xf32>, vector<128x128xf32>, vector<8x128xf32> -> vector<8x128xf32>
      %c0_79 = arith.constant 0 : index
      %c0_80 = arith.constant 0 : index
      %242 = vector.load %arg7[%c0_79, %c0_80] : memref<1x128xf32, #tpu.memory_space<vmem>>, vector<1x128xf32>
      %243 = vector.broadcast %242 : vector<1x128xf32> to vector<8x128xf32>
      %244 = arith.addf %241, %243 : vector<8x128xf32>
      %c0_81 = arith.constant 0 : index
      %c0_82 = arith.constant 0 : index
      %245 = vector.load %arg8[%c0_81, %c0_82] : memref<8x128xf32, #tpu.memory_space<vmem>>, vector<8x128xf32>
      tpu.vector_store %arg8[%c0_81, %c0_82], %244 {strides = array<i32>} : memref<8x128xf32, #tpu.memory_space<vmem>>, vector<8x128xf32>,
    } else {
    }
    return
  }
  func.func @transform_0(%arg0: i32, %arg1: i32) -> (i32, i32) {
    %c1_i32 = arith.constant 1 : i32
    %0 = arith.muli %arg0, %c1_i32 : i32
    %1 = arith.addi %0, %arg1 : i32
    %c0_i32 = arith.constant 0 : i32
    %c0_i32_0 = arith.constant 0 : i32
    return %1, %c0_i32 : i32, i32
  }
  func.func @transform_1(%arg0: i32, %arg1: i32) -> (i32, i32) {
    %c0_i32 = arith.constant 0 : i32
    %c0_i32_0 = arith.constant 0 : i32
    %c0_i32_1 = arith.constant 0 : i32
    return %c0_i32, %c0_i32_0 : i32, i32
  }
  func.func @transform_2(%arg0: i32, %arg1: i32) -> (i32, i32) {
    %c0_i32 = arith.constant 0 : i32
    %c0_i32_0 = arith.constant 0 : i32
    %c0_i32_1 = arith.constant 0 : i32
    return %c0_i32, %c0_i32_0 : i32, i32
  }
  func.func @transform_3(%arg0: i32, %arg1: i32) -> (i32, i32) {
    %c0_i32 = arith.constant 0 : i32
    %c0_i32_0 = arith.constant 0 : i32
    %c0_i32_1 = arith.constant 0 : i32
    return %c0_i32, %c0_i32_0 : i32, i32
  }
  func.func @transform_4(%arg0: i32, %arg1: i32) -> (i32, i32) {
    %c0_i32 = arith.constant 0 : i32
    %c0_i32_0 = arith.constant 0 : i32
    %c0_i32_1 = arith.constant 0 : i32
    return %c0_i32, %c0_i32_0 : i32, i32
  }
  func.func @transform_5(%arg0: i32, %arg1: i32) -> (i32, i32) {
    %c0_i32 = arith.constant 0 : i32
    %c0_i32_0 = arith.constant 0 : i32
    %c0_i32_1 = arith.constant 0 : i32
    return %c0_i32, %c0_i32_0 : i32, i32
  }
  func.func @transform_6(%arg0: i32, %arg1: i32) -> (i32, i32) {
    %c0_i32 = arith.constant 0 : i32
    %c0_i32_0 = arith.constant 0 : i32
    return %arg0, %c0_i32 : i32, i32
  }
}

</mosaic_0001>

<bundles_post_ra>
// kernel: tpu_custom_call.1
= control target key start
LH: loop header
LB: loop body
LE: loop exit
PB: predicated region body
PF: predicated region fallthrough
CT: control target
= control target key end

     0   :  { %11 = vsyncpa [#allocation6], 0  ;;  %s3771_s0 = inlined_call_operand.vmem [shape: f32[64,4], index: 0, kind: input, shape index: {}]   ;;  %s3772_s1 = inlined_call_operand.vmem [shape: f32[4,512], index: 1, kind: input, shape index: {}]   ;;  %s3773_s2 = inlined_call_operand.hbm [shape: f32[128,512], index: 2, kind: input, shape index: {}]   ;;  %s3774_s3 = inlined_call_operand.vmem [shape: f32[1,512], index: 3, kind: input, shape index: {}]   ;;  %s3775_s4 = inlined_call_operand.hbm [shape: f32[128,128], index: 4, kind: input, shape index: {}]   ;;  %s3776_s5 = inlined_call_operand.vmem [shape: f32[1,128], index: 5, kind: input, shape index: {}]   ;;  %s3777_s6 = inlined_call_operand.hbm [shape: f32[8,128], index: 6, kind: output, shape index: {}]  }
   0x1   :  { %12 = vsyncpa [#allocation9], 0 }
   0x2   :  { %13 = vsyncpa [#allocation7], 0  ;;  %s3006_s21 = smov [#allocation5]   ;;  %s2934_s25 = scalar_lea.hbm %s3773_s2, 8192 }
   0x3   :  { %s31_s22 = sshll.u32 %s3006_s21, 4  ;;  %p2935_p0 = scmp.ne.s32.totalorder %s3773_s2, %s2934_s25  ;;  %s32_s22 = int_to_ptr.vmem [resolvable:$true] %s31_s22 }
   0x4   :  { %p2938_p1 = scmp.lt.u32.totalorder %s2934_s25, %s3773_s2 }
   0x6   :  { %p2940_p2 = pnand %p2938_p1, %p2935_p0 }
   0x8   :  { %2943 = shalt.err (!%p2940_p2)
}
   0x9   :  { %s2944_s30 = scalar_lea.vmem %s32_s22, 8192  ;;  %p2949_p4 = scmp.lt.s32.totalorder %s32_s22, %s32_s22 }
   0xa   :  { %p2945_p3 = scmp.ne.s32.totalorder %s32_s22, %s2944_s30  ;;  %p2950_p5 = scmp.lt.s32.totalorder %s2944_s30, %s2944_s30 }
   0xc   :  { %p2951_p6 = por %p2950_p5, %p2949_p4 }
   0xe   :  { %p2952_p7 = pnand %p2951_p6, %p2945_p3 }
  0x10   :  { %2955 = shalt.err (!%p2952_p7)
}
  0x11   :  { %s3007_s7 = smov 512   ;;  %s3008_s8 = smov 32  }
  0x12   :  { %37 = dma.hbm_to_vmem [thread:$0]  %s3773_s2, 8192, %s32_s22, [#allocation6], %s3007_s7, %s3007_s7, %s3008_s8  }
  0x13   :  { %s3009_s11 = smov [#allocation8]   ;;  %s2956_s15 = scalar_lea.hbm %s3775_s4, 2048 }
  0x14   :  { %s45_s12 = sshll.u32 %s3009_s11, 4  ;;  %p2957_p8 = scmp.ne.s32.totalorder %s3775_s4, %s2956_s15  ;;  %s46_s12 = int_to_ptr.vmem [resolvable:$true] %s45_s12 }
  0x15   :  { %p2960_p9 = scmp.lt.u32.totalorder %s2956_s15, %s3775_s4 }
  0x17   :  { %p2962_p10 = pnand %p2960_p9, %p2957_p8 }
  0x19   :  { %2965 = shalt.err (!%p2962_p10)
}
  0x1a   :  { %s2966_s20 = scalar_lea.vmem %s46_s12, 2048  ;;  %p2971_p12 = scmp.lt.s32.totalorder %s46_s12, %s46_s12 }
  0x1b   :  { %p2967_p11 = scmp.ne.s32.totalorder %s46_s12, %s2966_s20  ;;  %p2972_p13 = scmp.lt.s32.totalorder %s2966_s20, %s2966_s20 }
  0x1d   :  { %p2973_p0 = por %p2972_p13, %p2971_p12 }
  0x1f   :  { %p2974_p1 = pnand %p2973_p0, %p2967_p11 }
  0x21   :  { %2977 = shalt.err (!%p2974_p1)
}
  0x22   :  { %s3010_s2 = smov 128   ;;  %s3011_s21 = smov 8  }
  0x23   :  { %51 = dma.hbm_to_vmem [thread:$0]  %s3775_s4, 2048, %s46_s12, [#allocation9], %s3010_s2, %s3010_s2, %s3011_s21  }
  0x24   :  { %3000 = dma.done.wait [#allocation6], 8192  }
  0x25   :  { %3001 = vsyncadd [#allocation6], 4294959104 }
  0x26   :  { %3002 = dma.done.wait [#allocation9], 2048  }
  0x27   :  { %3003 = vsyncadd [#allocation9], 4294965248  ;;  %v3786_v0 = vmov 0.0   ;;  %v3778_v1 = vmov 2   ;;  %v3780_v2 = vmov 0   ;;  %v683_v3 = vld [vmem:[#allocation5 + $0x8] sm:$0xff] }
  0x28   :  { %819 = vmatprep.mubr.f32.mxu0 %v3786_v0  ;;  %890 = vmatprep.mubr.f32.mxu1 %v3786_v0  ;;  %v687_v4 = vld [vmem:[#allocation5 + $0x28] sm:$0xff]  ;;  %v685_v5 = vld [vmem:[#allocation5 + $0x18] sm:$0xff]  ;;  %v682_v8 = vld [vmem:[#allocation5] sm:$0xff]  ;;  %vm3018_vm0 = vmmov 0   ;;  %s3019_s20 = smov [#allocation10]  }
  0x29   :  { %2825 = vset.pattern.permute.xlu1 %v3778_v1  ;;  %2823 = vset.pattern.permute.xlu0 %v3780_v2  ;;  %v3083_v6 = vpack.c.bf16 %v687_v4, %v683_v3  ;;  %v689_v7 = vld [vmem:[#allocation5 + $0x38] sm:$0xff]  ;;  %v686_v9 = vld [vmem:[#allocation5 + $0x20] sm:$0xff]  ;;  %v684_v12 = vld [vmem:[#allocation5 + $0x10] sm:$0xff]  ;;  %s2197_s2 = sshll.u32 %s3019_s20, 4  ;;  %s2198_s2 = int_to_ptr.vmem [resolvable:$true] %s2197_s2 }
  0x2a   :  { %v3085_v10 = vpack.c.bf16 %v689_v7, %v685_v5  ;;  %v3087_v11 = vpack.c.bf16 %v686_v9, %v682_v8  ;;  %v688_v13 = vld [vmem:[#allocation5 + $0x30] sm:$0xff]  ;;  %v691_v14 = vld [vmem:[#allocation5 + $0x48] sm:$0xff]  ;;  %v693_v17 = vld [vmem:[#allocation5 + $0x58] sm:$0xff]  ;;  %s2978_s21 = scalar_lea.vmem %s2198_s2, 128  ;;  %p2983_p3 = scmp.lt.s32.totalorder %s2198_s2, %s2198_s2 }
  0x2b   :  { %3831 = vst [vmem:[#allocation14_spill] sm:$0xff] %v3083_v6  ;;  %2274 = vmatprep.subr.bf16.mxu0 %v3083_v6  ;;  %v3090_v15 = vpack.c.bf16 %v688_v13, %v684_v12  ;;  %v695_v16 = vld [vmem:[#allocation5 + $0x68] sm:$0xff]  ;;  %v697_v18 = vld [vmem:[#allocation5 + $0x78] sm:$0xff]  ;;  %v690_v21 = vld [vmem:[#allocation5 + $0x40] sm:$0xff]  ;;  %p2979_p2 = scmp.ne.s32.totalorder %s2198_s2, %s2978_s21  ;;  %p2984_p4 = scmp.lt.s32.totalorder %s2978_s21, %s2978_s21 }
  0x2c   :  { %3832 = vst [vmem:[#allocation15_spill] sm:$0xff] %v3085_v10  ;;  %2306 = vmatprep.subr.bf16.mxu1 %v3085_v10  ;;  %2276 = vmatpush1.bf16.msra.mxu0 %v3087_v11  ;;  %v3094_v19 = vpack.c.bf16 %v695_v16, %v691_v14  ;;  %v3096_v20 = vpack.c.bf16 %v697_v18, %v693_v17  ;;  %v694_v22 = vld [vmem:[#allocation5 + $0x60] sm:$0xff]  ;;  %v692_v23 = vld [vmem:[#allocation5 + $0x50] sm:$0xff]  ;;  %v699_v26 = vld [vmem:[#allocation5 + $0x88] sm:$0xff] }
  0x2d   :  { %2308 = vmatpush1.bf16.msra.mxu1 %v3090_v15  ;;  %v3099_v24 = vpack.c.bf16 %v694_v22, %v690_v21  ;;  %v696_v25 = vld [vmem:[#allocation5 + $0x70] sm:$0xff]  ;;  %v703_v27 = vld [vmem:[#allocation5 + $0xa8] sm:$0xff]  ;;  %v701_v30 = vld [vmem:[#allocation5 + $0x98] sm:$0xff]  ;;  %p2985_p5 = por %p2984_p4, %p2983_p3 }
  0x2e   :  { %2278 = vmatprep.subr.bf16.mxu0 %v3094_v19  ;;  %2310 = vmatprep.subr.bf16.mxu1 %v3096_v20  ;;  %v3103_v28 = vpack.c.bf16 %v696_v25, %v692_v23  ;;  %v3105_v29 = vpack.c.bf16 %v703_v27, %v699_v26  ;;  %v705_v31 = vld [vmem:[#allocation5 + $0xb8] sm:$0xff]  ;;  %v698_v32 = vld [vmem:[#allocation5 + $0x80] sm:$0xff]  ;;  %v700_v35 = vld [vmem:[#allocation5 + $0x90] sm:$0xff] }
  0x2f   :  { %v3107_v33 = vpack.c.bf16 %v705_v31, %v701_v30  ;;  %v702_v34 = vld [vmem:[#allocation5 + $0xa0] sm:$0xff]  ;;  %v704_v36 = vld [vmem:[#allocation5 + $0xb0] sm:$0xff]  ;;  %v707_v38 = vld [vmem:[#allocation5 + $0xc8] sm:$0xff]  ;;  %p2986_p6 = pnand %p2985_p5, %p2979_p2 }
  0x30   :  { %2280 = vmatpush1.bf16.msra.mxu0 %v3099_v24  ;;  %v3110_v37 = vpack.c.bf16 %v702_v34, %v698_v32  ;;  %v711_v39 = vld [vmem:[#allocation5 + $0xe8] sm:$0xff]  ;;  %v709_v40 = vld [vmem:[#allocation5 + $0xd8] sm:$0xff]  ;;  %v3114_v41 = vpack.c.bf16 %v704_v36, %v700_v35  ;;  %v706_v44 = vld [vmem:[#allocation5 + $0xc0] sm:$0xff] }
  0x31   :  { %2312 = vmatpush1.bf16.msra.mxu1 %v3103_v28  ;;  %2282 = vmatprep.subr.bf16.mxu0 %v3105_v29  ;;  %v3116_v42 = vpack.c.bf16 %v711_v39, %v707_v38  ;;  %v713_v43 = vld [vmem:[#allocation5 + $0xf8] sm:$0xff]  ;;  %v710_v45 = vld [vmem:[#allocation5 + $0xe0] sm:$0xff]  ;;  %v708_v47 = vld [vmem:[#allocation5 + $0xd0] sm:$0xff] }
  0x32   :  { %2314 = vmatprep.subr.bf16.mxu1 %v3107_v33  ;;  %v3119_v46 = vpack.c.bf16 %v713_v43, %v709_v40  ;;  %v712_v48 = vld [vmem:[#allocation5 + $0xf0] sm:$0xff]  ;;  %v715_v49 = vld [vmem:[#allocation5 + $0x108] sm:$0xff]  ;;  %v717_v51 = vld [vmem:[#allocation5 + $0x118] sm:$0xff]  ;;  %v3122_v53 = vpack.c.bf16 %v710_v45, %v706_v44 }
  0x33   :  { %v719_v50 = vld [vmem:[#allocation5 + $0x128] sm:$0xff]  ;;  %v721_v52 = vld [vmem:[#allocation5 + $0x138] sm:$0xff]  ;;  %v3126_v54 = vpack.c.bf16 %v712_v48, %v708_v47  ;;  %v714_v56 = vld [vmem:[#allocation5 + $0x100] sm:$0xff] }
  0x34   :  { %2284 = vmatpush1.bf16.msra.mxu0 %v3110_v37  ;;  %v3128_v55 = vpack.c.bf16 %v719_v50, %v715_v49  ;;  %v718_v57 = vld [vmem:[#allocation5 + $0x120] sm:$0xff]  ;;  %v716_v58 = vld [vmem:[#allocation5 + $0x110] sm:$0xff]  ;;  %v3131_v59 = vpack.c.bf16 %v721_v52, %v717_v51  ;;  %v723_v61 = vld [vmem:[#allocation5 + $0x148] sm:$0xff]  ;;  %v3782_v51 = vmov 3   ;;  %v3784_v52 = vmov 1  }
  0x35   :  { %2316 = vmatpush1.bf16.msra.mxu1 %v3114_v41  ;;  %2286 = vmatprep.subr.bf16.mxu0 %v3116_v42  ;;  %v720_v60 = vld [vmem:[#allocation5 + $0x130] sm:$0xff]  ;;  %v727_v62 = vld [vmem:[#allocation5 + $0x168] sm:$0xff]  ;;  %v725_v63 = vld [vmem:[#allocation5 + $0x158] sm:$0xff]  ;;  %v3134_v4 = vpack.c.bf16 %v718_v57, %v714_v56 }
  0x36   :  { %2318 = vmatprep.subr.bf16.mxu1 %v3119_v46  ;;  %v729_v3 = vld [vmem:[#allocation5 + $0x178] sm:$0xff]  ;;  %v3138_v5 = vpack.c.bf16 %v720_v60, %v716_v58  ;;  %v3140_v7 = vpack.c.bf16 %v727_v62, %v723_v61  ;;  %v722_v8 = vld [vmem:[#allocation5 + $0x140] sm:$0xff]  ;;  %v724_v12 = vld [vmem:[#allocation5 + $0x150] sm:$0xff]  ;;  %v132_v60 = vlaneseq }
  0x37   :  { %v726_v9 = vld [vmem:[#allocation5 + $0x160] sm:$0xff]  ;;  %v3143_v13 = vpack.c.bf16 %v729_v3, %v725_v63  ;;  %v728_v14 = vld [vmem:[#allocation5 + $0x170] sm:$0xff]  ;;  %v731_v16 = vld [vmem:[#allocation5 + $0x188] sm:$0xff] }
  0x38   :  { %2288 = vmatpush1.bf16.msra.mxu0 %v3122_v53  ;;  %v735_v17 = vld [vmem:[#allocation5 + $0x1a8] sm:$0xff]  ;;  %v733_v18 = vld [vmem:[#allocation5 + $0x198] sm:$0xff]  ;;  %v3146_v22 = vpack.c.bf16 %v726_v9, %v722_v8  ;;  %v730_v23 = vld [vmem:[#allocation5 + $0x180] sm:$0xff]  ;;  %v3150_v25 = vpack.c.bf16 %v728_v14, %v724_v12  ;;  %v3230_v61 = vshrl.u32 %v132_v60, 7 }
  0x39   :  { %2320 = vmatpush1.bf16.msra.mxu1 %v3126_v54  ;;  %2290 = vmatprep.subr.bf16.mxu0 %v3128_v55  ;;  %v737_v21 = vld [vmem:[#allocation5 + $0x1b8] sm:$0xff]  ;;  %v3152_v26 = vpack.c.bf16 %v735_v17, %v731_v16  ;;  %v734_v27 = vld [vmem:[#allocation5 + $0x1a0] sm:$0xff]  ;;  %v732_v30 = vld [vmem:[#allocation5 + $0x190] sm:$0xff] }
  0x3a   :  { %2322 = vmatprep.subr.bf16.mxu1 %v3131_v59  ;;  %v80_v31 = vld [vmem:[%s3771_s0] sm:$0xff]  ;;  %v3158_v32 = vpack.c.bf16 %v737_v21, %v733_v18  ;;  %v736_v34 = vld [vmem:[#allocation5 + $0x1b0] sm:$0xff]  ;;  %v739_v35 = vld [vmem:[#allocation5 + $0x1c8] sm:$0xff]  ;;  %v3161_v40 = vpack.c.bf16 %v734_v27, %v730_v23  ;;  %v3233_v62 = vsub.s32 0, %v3230_v61  ;;  %v3236_v63 = vsub.s32 1, %v3230_v61 }
  0x3b   :  { %v743_v36 = vld [vmem:[#allocation5 + $0x1e8] sm:$0xff]  ;;  %333 = vperm.xlu1 %2825, %v80_v31   ;;  %v741_v38 = vld [vmem:[#allocation5 + $0x1d8] sm:$0xff]  ;;  %92 = vperm.xlu0 %2823, %v80_v31   ;;  %v3165_v43 = vpack.c.bf16 %v736_v34, %v732_v30  ;;  %v738_v45 = vld [vmem:[#allocation5 + $0x1c0] sm:$0xff]  ;;  %v138_v8 = vsub.s32 4, %v3230_v61  ;;  %v238_v9 = vsub.s32 5, %v3230_v61  ;;  %v3247_v16 = vsub.s32 2, %v3230_v61 }
  0x3c   :  { %2292 = vmatpush1.bf16.msra.mxu0 %v3134_v4  ;;  %v745_v39 = vld [vmem:[#allocation5 + $0x1f8] sm:$0xff]  ;;  %v3167_v44 = vpack.c.bf16 %v743_v36, %v739_v35  ;;  %v742_v47 = vld [vmem:[#allocation5 + $0x1e0] sm:$0xff]  ;;  %v740_v49 = vld [vmem:[#allocation5 + $0x1d0] sm:$0xff]  ;;  %v370_v21 = vsub.s32 6, %v3230_v61  ;;  %v3259_v36 = vsub.s32 3, %v3230_v61 }
  0x3d   :  { %2324 = vmatpush1.bf16.msra.mxu1 %v3138_v5  ;;  %2294 = vmatprep.subr.bf16.mxu0 %v3140_v7  ;;  %3833 = vst [vmem:[#allocation16_spill] sm:$0xff] %v3165_v43  ;;  %v3170_v48 = vpack.c.bf16 %v745_v39, %v741_v38  ;;  %v744_v50 = vld [vmem:[#allocation5 + $0x1f0] sm:$0xff]  ;;  %v3175_v56 = vpack.c.bf16 %v742_v47, %v738_v45  ;;  %v81_v58 = vld [vmem:[%s3771_s0 + $0x8] sm:$0xff]  ;;  %v88_v3 = vld [vmem:[%s3772_s1] sm:$0xff]  ;;  %v502_v47 = vsub.s32 7, %v3230_v61 }
  0x3e   :  { %2326 = vmatprep.subr.bf16.mxu1 %v3143_v13  ;;  %3834 = vst [vmem:[#allocation17_spill] sm:$0xff] %v3167_v44  ;;  %v3179_v57 = vpack.c.bf16 %v744_v50, %v740_v49  ;;  %v89_v12 = vld [vmem:[%s3772_s1 + $0x8] sm:$0xff]  ;;  %v135_v17 = vrot.slane %v88_v3, %v3233_v62  ;;  %v235_v18 = vrot.slane %v88_v3, %v3236_v63 }
  0x3f   :  { %3835 = vst [vmem:[#allocation18_spill] sm:$0xff] %v3170_v48  ;;  %2826 = vset.pattern.permute.xlu1 %v3782_v51  ;;  %2824 = vset.pattern.permute.xlu0 %v3784_v52  ;;  %3836 = vst [vmem:[#allocation19_spill] sm:$0xff] %v3175_v56  ;;  %v139_v23 = vrot.slane %v88_v3, %v138_v8  ;;  %v239_v27 = vrot.slane %v88_v3, %v238_v9 }
  0x40   :  { %2296 = vmatpush1.bf16.msra.mxu0 %v3146_v22  ;;  %465 = vperm.xlu1 %2826, %v80_v31   ;;  %3837 = vst [vmem:[#allocation20_spill] sm:$0xff] %v3179_v57  ;;  %v143_v30 = vrot.slane %v89_v12, %v3233_v62  ;;  %v367_v34 = vrot.slane %v88_v3, %v3247_v16 }
  0x41   :  { %2328 = vmatpush1.bf16.msra.mxu1 %v3150_v25  ;;  %2298 = vmatprep.subr.bf16.mxu0 %v3152_v26  ;;  %v3256_v35 = vrot.slane %v135_v17, %v3233_v62  ;;  %v3262_v38 = vrot.slane %v235_v18, %v3236_v63  ;;  %v371_v39 = vrot.slane %v88_v3, %v370_v21 }
  0x42   :  { %2330 = vmatprep.subr.bf16.mxu1 %v3158_v32  ;;  %201 = vperm.xlu0 %2824, %v80_v31   ;;  %v243_v31 = vrot.slane %v89_v12, %v3236_v63  ;;  %v3265_v45 = vrot.slane %v139_v23, %v3233_v62  ;;  %v3269_v49 = vrot.slane %v239_v27, %v3236_v63 }
  0x43   :  { %3838 = vst [vmem:[#allocation21_spill] sm:$0xff] %v3256_v35  ;;  %3839 = vst [vmem:[#allocation22_spill] sm:$0xff] %v3262_v38  ;;  %v3273_v60 = vrot.slane %v143_v30, %v3233_v62  ;;  %v3279_v18 = vrot.slane %v367_v34, %v3247_v16  ;;  %v3285_v27 = vrot.slane %v371_v39, %v3247_v16 }
  0x44   :  { %2300 = vmatpush1.bf16.msra.mxu0 %v3161_v40  ;;  %2827 = vset.pattern.permute.xlu1 %v3780_v2  ;;  %3840 = vst [vmem:[#allocation23_spill] sm:$0xff] %v3265_v45  ;;  %3841 = vst [vmem:[#allocation24_spill] sm:$0xff] %v3269_v49  ;;  %v3276_v17 = vrot.slane %v243_v31, %v3236_v63  ;;  %v503_v30 = vrot.slane %v88_v3, %v502_v47 }
  0x45   :  { %2332 = vmatpush1.bf16.msra.mxu1 %v3165_v43  ;;  %2302 = vmatprep.subr.bf16.mxu0 %v3167_v44  ;;  %3842 = vst [vmem:[#allocation25_spill] sm:$0xff] %v3273_v60  ;;  %3844 = vst [vmem:[#allocation27_spill] sm:$0xff] %v3279_v18 }
  0x46   :  { %2334 = vmatprep.subr.bf16.mxu1 %v3170_v48  ;;  %97 = vperm.xlu1 %2827, %v81_v58   ;;  %3843 = vst [vmem:[#allocation26_spill] sm:$0xff] %v3276_v17  ;;  %3845 = vst [vmem:[#allocation28_spill] sm:$0xff] %v3285_v27 }
  0x47   :  { %205 = vperm.xlu0 %2824, %v81_v58  }
  0x48   :  { %2304 = vmatpush1.bf16.msra.mxu0 %v3175_v56 }
  0x49   :  { %2336 = vmatpush1.bf16.msra.mxu1 %v3179_v57  ;;  %2338 = vmatprep.subr.bf16.mxu0 %v3083_v6 }
  0x4a   :  { %2370 = vmatprep.subr.bf16.mxu1 %v3085_v10  ;;  %2828 = vset.pattern.permute.xlu1 %v3778_v1 }
  0x4b   :  { %820 = vmatmul.mubr.f32.vlgmr.msra.gmra.mrb[0].mxu0 %v3786_v0  ;;  %337 = vperm.xlu1 %2828, %v81_v58  }
  0x4c   :  { %891 = vmatmul.mubr.f32.vlgmr.msra.gmra.mrb[0].mxu1 %v3786_v0  ;;  %2829 = vset.pattern.permute.xlu0 %v3782_v51 }
  0x4d   :  { %469 = vperm.xlu0 %2829, %v81_v58   ;;  %2340 = vmatpush1.bf16.msra.mxu0 %v3087_v11  ;;  %v375_v58 = vrot.slane %v89_v12, %v3247_v16 }
  0x4e   :  { %2372 = vmatpush1.bf16.msra.mxu1 %v3090_v15  ;;  %2342 = vmatprep.subr.bf16.mxu0 %v3094_v19 }
  0x4f   :  { %2374 = vmatprep.subr.bf16.mxu1 %v3096_v20  ;;  %987 = vmatprep.mubr.f32.mxu0 %v3786_v0  ;;  %v3290_v31 = vrot.slane %v375_v58, %v3247_v16 }
  0x50   :  { %1058 = vmatprep.mubr.f32.mxu1 %v3786_v0  ;;  %2830 = vset.pattern.permute.xlu1 %v3780_v2  ;;  %v507_v0 = vrot.slane %v89_v12, %v3259_v36 }
  0x51   :  { %2344 = vmatpush1.bf16.msra.mxu0 %v3099_v24  ;;  %2832 = vset.pattern.permute.xlu0 %v3778_v1  ;;  %v499_v1 = vrot.slane %v88_v3, %v3259_v36  ;;  %3846 = vst [vmem:[#allocation29_spill] sm:$0xff] %v3290_v31 }
  0x52   :  { %2376 = vmatpush1.bf16.msra.mxu1 %v3103_v28  ;;  %2346 = vmatprep.subr.bf16.mxu0 %v3105_v29 }
  0x53   :  { %2378 = vmatprep.subr.bf16.mxu1 %v3107_v33 }
  0x55   :  { %2348 = vmatpush1.bf16.msra.mxu0 %v3110_v37 }
  0x56   :  { %2380 = vmatpush1.bf16.msra.mxu1 %v3114_v41  ;;  %2350 = vmatprep.subr.bf16.mxu0 %v3116_v42 }
  0x57   :  { %2382 = vmatprep.subr.bf16.mxu1 %v3119_v46 }
  0x59   :  { %2352 = vmatpush1.bf16.msra.mxu0 %v3122_v53 }
  0x5a   :  { %2384 = vmatpush1.bf16.msra.mxu1 %v3126_v54  ;;  %2354 = vmatprep.subr.bf16.mxu0 %v3128_v55 }
  0x5b   :  { %2386 = vmatprep.subr.bf16.mxu1 %v3131_v59 }
  0x5d   :  { %2356 = vmatpush1.bf16.msra.mxu0 %v3134_v4 }
  0x5e   :  { %2388 = vmatpush1.bf16.msra.mxu1 %v3138_v5  ;;  %2358 = vmatprep.subr.bf16.mxu0 %v3140_v7 }
  0x5f   :  { %2390 = vmatprep.subr.bf16.mxu1 %v3143_v13 }
  0x61   :  { %2360 = vmatpush1.bf16.msra.mxu0 %v3146_v22 }
  0x62   :  { %2392 = vmatpush1.bf16.msra.mxu1 %v3150_v25  ;;  %2362 = vmatprep.subr.bf16.mxu0 %v3152_v26 }
  0x63   :  { %2394 = vmatprep.subr.bf16.mxu1 %v3158_v32 }
  0x65   :  { %2364 = vmatpush1.bf16.msra.mxu0 %v3161_v40 }
  0x66   :  { %2396 = vmatpush1.bf16.msra.mxu1 %v3165_v43  ;;  %2366 = vmatprep.subr.bf16.mxu0 %v3167_v44 }
  0x67   :  { %2398 = vmatprep.subr.bf16.mxu1 %v3170_v48 }
  0x69   :  { %2368 = vmatpush1.bf16.msra.mxu0 %v3175_v56 }
  0x6a   :  { %2400 = vmatpush1.bf16.msra.mxu1 %v3179_v57  ;;  %2402 = vmatprep.subr.bf16.mxu0 %v3083_v6  ;;  %v3297_v6 = vrot.slane %v499_v1, %v3259_v36  ;;  %v3305_v57 = vrot.slane %v507_v0, %v3259_v36 }
  0x6b   :  { %2434 = vmatprep.subr.bf16.mxu1 %v3085_v10  ;;  %v147_v10 = vrot.slane %v89_v12, %v138_v8  ;;  %v379_v8 = vrot.slane %v89_v12, %v370_v21 }
  0x6c   :  { %3847 = vst [vmem:[#allocation30_spill] sm:$0xff] %v3297_v6 }
  0xba   :  { %v93_v14 = vpop.permute.xlu0 %92  ;;  %v334_v2 = vpop.permute.xlu1 %333 }
  0xbb   :  { %v168_v23 = vmul.f32 %v3256_v35, %v93_v14  ;;  %v169_v51 = vmul.f32 %v3265_v45, %v93_v14  ;;  %v170_v34 = vmul.f32 %v3273_v60, %v93_v14  ;;  %v400_v39 = vmul.f32 %v3279_v18, %v334_v2 }
  0xbc   :  { %v401_v3 = vmul.f32 %v3285_v27, %v334_v2  ;;  %v402_v60 = vmul.f32 %v3290_v31, %v334_v2 }
  0xbf   :  { %v466_v18 = vpop.permute.xlu1 %465 }
  0xc1   :  { %v202_v50 = vpop.permute.xlu0 %201 }
  0xc2   :  { %v268_v61 = vmul.f32 %v3262_v38, %v202_v50  ;;  %v269_v52 = vmul.f32 %v3269_v49, %v202_v50  ;;  %v270_v35 = vmul.f32 %v3276_v17, %v202_v50  ;;  %v247_v38 = vrot.slane %v89_v12, %v238_v9 }
  0xc3   :  { %v3301_v49 = vrot.slane %v503_v30, %v3259_v36  ;;  %v3308_v9 = vrot.slane %v147_v10, %v3233_v62  ;;  %v3320_v10 = vrot.slane %v379_v8, %v3247_v16 }
  0xc4   :  { %v300_v45 = vadd.f32 %v268_v61, %v168_v23  ;;  %v301_v58 = vadd.f32 %v269_v52, %v169_v51  ;;  %v302_v17 = vadd.f32 %v270_v35, %v170_v34  ;;  %v3311_v1 = vrot.slane %v247_v38, %v3236_v63  ;;  %v596_v51 = vld [vmem:[%s3774_s3] sm:$0xf] }
  0xc5   :  { %3848 = vst [vmem:[#allocation31_spill] sm:$0xff] %v3301_v49  ;;  %v532_v23 = vmul.f32 %v3297_v6, %v466_v18  ;;  %v533_v30 = vmul.f32 %v3301_v49, %v466_v18  ;;  %v534_v52 = vmul.f32 %v3305_v57, %v466_v18  ;;  %v171_v35 = vmul.f32 %v3308_v9, %v93_v14 }
  0xc6   :  { %v432_v61 = vadd.f32 %v400_v39, %v300_v45  ;;  %v433_v0 = vadd.f32 %v401_v3, %v301_v58  ;;  %v434_v21 = vadd.f32 %v402_v60, %v302_v17  ;;  %v511_v38 = vrot.slane %v89_v12, %v502_v47 }
  0xc7   :  { %v271_v34 = vmul.f32 %v3311_v1, %v202_v50  ;;  %v3325_v45 = vrot.slane %v596_v51, %v3233_v62  ;;  %v3328_v49 = vrot.slane %v596_v51, %v3236_v63  ;;  %v3331_v58 = vrot.slane %v596_v51, %v3247_v16 }
  0xc8   :  { %v564_v6 = vadd.f32 %v532_v23, %v432_v61  ;;  %v565_v39 = vadd.f32 %v533_v30, %v433_v0  ;;  %v566_v3 = vadd.f32 %v534_v52, %v434_v21  ;;  %v403_v60 = vmul.f32 %v3320_v10, %v334_v2 }
  0xc9   :  { %v3335_v17 = vrot.slane %v511_v38, %v3259_v36  ;;  %v303_v12 = vadd.f32 %v271_v34, %v171_v35  ;;  %v3342_v21 = vrot.slane %v596_v51, %v3259_v36 }
  0xca   :  { %v618_v14 = vadd.f32 %v3325_v45, %v564_v6  ;;  %v619_v62 = vadd.f32 %v3328_v49, %v565_v39  ;;  %v620_v8 = vadd.f32 %v3331_v58, %v566_v3 }
  0xcb   :  { %v535_v61 = vmul.f32 %v3335_v17, %v466_v18  ;;  %v435_v30 = vadd.f32 %v403_v60, %v303_v12 }
  0xcd   :  { %v567_v52 = vadd.f32 %v535_v61, %v435_v30  ;;  %v3850_v61 = vld [vmem:[#allocation20_spill] sm:$0xff]  ;;  %v3852_v30 = vld [vmem:[#allocation15_spill] sm:$0xff] }
  0xcf   :  { %v621_v6 = vadd.f32 %v3342_v21, %v567_v52  ;;  %v3854_v52 = vmov 3  }
 0x11e   :  { %v821_v47 = vpop.f32.mrb[0].mxu0 }
 0x11f   :  { %v897_v50 = vadd.f32 %v821_v47, %v618_v14  ;;  %v892_v63 = vpop.f32.mrb[0].mxu1  ;;  %v823_v23 = vpop.f32.mrb[1].mxu0 }
 0x120   :  { %v898_v16 = vadd.f32 %v823_v23, %v619_v62  ;;  %v894_v0 = vpop.f32.mrb[1].mxu1  ;;  %v899_v2 = vadd.f32 %v892_v63, %v620_v8  ;;  %v3849_v23 = vmov 0.0  }
 0x121   :  { %2854 = vtanh.f32 %v897_v50  ;;  %v900_v35 = vadd.f32 %v894_v0, %v621_v6  ;;  %v82_v0 = vld [vmem:[%s3771_s0 + $0x10] sm:$0xff]  ;;  %v3855_v6 = vmov 0  }
 0x122   :  { %2856 = vtanh.f32 %v898_v16  ;;  %v3851_v16 = vld [vmem:[#allocation14_spill] sm:$0xff]  ;;  %102 = vperm.xlu1 %2830, %v82_v0   ;;  %341 = vperm.xlu0 %2832, %v82_v0  }
 0x123   :  { %2858 = vtanh.f32 %v899_v2  ;;  %v3853_v2 = vmov 1  }
 0x124   :  { %2860 = vtanh.f32 %v900_v35  ;;  %v98_v35 = vpop.permute.xlu1 %97 }
 0x126   :  { %2831 = vset.pattern.permute.xlu1 %v3853_v2  ;;  %2835 = vset.pattern.permute.xlu0 %v3853_v2 }
 0x127   :  { %209 = vperm.xlu1 %2831, %v82_v0  }
 0x12b   :  { %v2855_v38 = vpop.eup %2854  ;;  %2833 = vset.pattern.permute.xlu1 %v3854_v52  ;;  %v3862_v52 = vld [vmem:[#allocation27_spill] sm:$0xff] }
 0x12c   :  { %v905_v34 = vmul.f32 0.5, %v2855_v38  ;;  %v2857_v39 = vpop.eup %2856  ;;  %473 = vperm.xlu1 %2833, %v82_v0   ;;  %v206_v38 = vpop.permute.xlu0 %205 }
 0x12d   :  { %v906_v14 = vmul.f32 0.5, %v2857_v39  ;;  %v2859_v18 = vpop.eup %2858 }
 0x12e   :  { %v907_v3 = vadd.f32 0.5, %v905_v34  ;;  %v2861_v36 = vpop.eup %2860  ;;  %v3856_v34 = vld [vmem:[#allocation21_spill] sm:$0xff] }
 0x12f   :  { %v908_v60 = vadd.f32 0.5, %v906_v14  ;;  %v909_v51 = vmul.f32 0.5, %v2861_v36  ;;  %v172_v39 = vmul.f32 %v3856_v34, %v98_v35  ;;  %v338_v36 = vpop.permute.xlu1 %337 }
 0x130   :  { %v912_v12 = vmul.f32 %v2859_v18, %v907_v3  ;;  %2834 = vset.pattern.permute.xlu1 %v3855_v6  ;;  %v3857_v3 = vld [vmem:[#allocation22_spill] sm:$0xff]  ;;  %v3858_v18 = vld [vmem:[#allocation23_spill] sm:$0xff]  ;;  %v404_v0 = vmul.f32 %v3862_v52, %v338_v36  ;;  %v405_v6 = vmul.f32 %v3285_v27, %v338_v36  ;;  %v406_v34 = vmul.f32 %v3290_v31, %v338_v36 }
 0x131   :  { %v911_v47 = vmul.f32 0.0, %v908_v60  ;;  %v910_v50 = vadd.f32 0.5, %v909_v51  ;;  %v272_v14 = vmul.f32 %v3857_v3, %v206_v38  ;;  %v173_v60 = vmul.f32 %v3858_v18, %v98_v35  ;;  %v3860_v51 = vld [vmem:[#allocation25_spill] sm:$0xff]  ;;  %v3863_v3 = vld [vmem:[#allocation30_spill] sm:$0xff] }
 0x133   :  { %v3345_v62 = vadd.f32 %v912_v12, %v911_v47  ;;  %v3859_v12 = vld [vmem:[#allocation24_spill] sm:$0xff]  ;;  %v304_v2 = vadd.f32 %v272_v14, %v172_v39  ;;  %v175_v39 = vmul.f32 %v3308_v9, %v98_v35  ;;  %v275_v14 = vmul.f32 %v3311_v1, %v206_v38 }
 0x134   :  { %v273_v47 = vmul.f32 %v3859_v12, %v206_v38 }
 0x135   :  { %2862 = vtanh.f32 %v3345_v62  ;;  %v436_v18 = vadd.f32 %v404_v0, %v304_v2  ;;  %v307_v52 = vadd.f32 %v275_v14, %v175_v39 }
 0x13f   :  { %v2863_v8 = vpop.eup %2862 }
 0x140   :  { %v915_v63 = vmul.f32 %v2863_v8, %v910_v50  ;;  %v174_v50 = vmul.f32 %v3860_v51, %v98_v35  ;;  %v3861_v8 = vld [vmem:[#allocation26_spill] sm:$0xff] }
 0x142   :  { %988 = vmatmul.mubr.f32.vlgmr.msra.gmra.mrb[2].mxu0 %v915_v63  ;;  %1059 = vmatmul.mubr.f32.vlgmr.msra.gmra.mrb[2].mxu1 %v915_v63  ;;  %v274_v63 = vmul.f32 %v3861_v8, %v206_v38 }
 0x143   :  { %2404 = vmatpush1.bf16.msra.mxu0 %v3087_v11  ;;  %2436 = vmatpush1.bf16.msra.mxu1 %v3090_v15 }
 0x144   :  { %2406 = vmatprep.subr.bf16.mxu0 %v3094_v19  ;;  %2438 = vmatprep.subr.bf16.mxu1 %v3096_v20 }
 0x145   :  { %1155 = vmatprep.mubr.f32.mxu0 %v3849_v23  ;;  %1226 = vmatprep.mubr.f32.mxu1 %v3849_v23 }
 0x147   :  { %2408 = vmatpush1.bf16.msra.mxu0 %v3099_v24  ;;  %2440 = vmatpush1.bf16.msra.mxu1 %v3103_v28 }
 0x148   :  { %2410 = vmatprep.subr.bf16.mxu0 %v3105_v29  ;;  %2442 = vmatprep.subr.bf16.mxu1 %v3107_v33 }
 0x14b   :  { %2412 = vmatpush1.bf16.msra.mxu0 %v3110_v37  ;;  %2444 = vmatpush1.bf16.msra.mxu1 %v3114_v41 }
 0x14c   :  { %2414 = vmatprep.subr.bf16.mxu0 %v3116_v42  ;;  %2446 = vmatprep.subr.bf16.mxu1 %v3119_v46 }
 0x14f   :  { %2416 = vmatpush1.bf16.msra.mxu0 %v3122_v53  ;;  %2448 = vmatpush1.bf16.msra.mxu1 %v3126_v54 }
 0x150   :  { %2418 = vmatprep.subr.bf16.mxu0 %v3128_v55  ;;  %2450 = vmatprep.subr.bf16.mxu1 %v3131_v59 }
 0x153   :  { %2420 = vmatpush1.bf16.msra.mxu0 %v3134_v4  ;;  %2452 = vmatpush1.bf16.msra.mxu1 %v3138_v5 }
 0x154   :  { %2422 = vmatprep.subr.bf16.mxu0 %v3140_v7  ;;  %2454 = vmatprep.subr.bf16.mxu1 %v3143_v13 }
 0x157   :  { %2424 = vmatpush1.bf16.msra.mxu0 %v3146_v22  ;;  %2456 = vmatpush1.bf16.msra.mxu1 %v3150_v25 }
 0x158   :  { %2426 = vmatprep.subr.bf16.mxu0 %v3152_v26  ;;  %2458 = vmatprep.subr.bf16.mxu1 %v3158_v32 }
 0x15b   :  { %2428 = vmatpush1.bf16.msra.mxu0 %v3161_v40  ;;  %2460 = vmatpush1.bf16.msra.mxu1 %v3165_v43 }
 0x15c   :  { %2430 = vmatprep.subr.bf16.mxu0 %v3167_v44  ;;  %2462 = vmatprep.subr.bf16.mxu1 %v3170_v48  ;;  %v3864_v48 = vld [vmem:[#allocation31_spill] sm:$0xff] }
 0x15f   :  { %2432 = vmatpush1.bf16.msra.mxu0 %v3175_v56  ;;  %2464 = vmatpush1.bf16.msra.mxu1 %v3850_v61  ;;  %v306_v61 = vadd.f32 %v274_v63, %v174_v50  ;;  %v407_v50 = vmul.f32 %v3320_v10, %v338_v36 }
 0x160   :  { %2466 = vmatprep.subr.bf16.mxu0 %v3851_v16  ;;  %2498 = vmatprep.subr.bf16.mxu1 %v3852_v30  ;;  %v305_v30 = vadd.f32 %v273_v47, %v173_v60  ;;  %v470_v16 = vpop.permute.xlu0 %469 }
 0x161   :  { %v536_v56 = vmul.f32 %v3863_v3, %v470_v16  ;;  %v537_v12 = vmul.f32 %v3864_v48, %v470_v16  ;;  %v538_v51 = vmul.f32 %v3305_v57, %v470_v16  ;;  %v438_v43 = vadd.f32 %v406_v34, %v306_v61 }
 0x162   :  { %v437_v44 = vadd.f32 %v405_v6, %v305_v30  ;;  %v539_v35 = vmul.f32 %v3335_v17, %v470_v16 }
 0x163   :  { %v568_v60 = vadd.f32 %v536_v56, %v436_v18  ;;  %v570_v27 = vadd.f32 %v538_v51, %v438_v43  ;;  %v439_v56 = vadd.f32 %v407_v50, %v307_v52 }
 0x164   :  { %v569_v47 = vadd.f32 %v537_v12, %v437_v44 }
 0x165   :  { %v622_v63 = vadd.f32 %v3325_v45, %v568_v60  ;;  %v624_v6 = vadd.f32 %v3331_v58, %v570_v27  ;;  %v571_v44 = vadd.f32 %v539_v35, %v439_v56  ;;  %v3869_v35 = vld [vmem:[#allocation20_spill] sm:$0xff]  ;;  %v3871_v56 = vld [vmem:[#allocation15_spill] sm:$0xff] }
 0x166   :  { %v623_v0 = vadd.f32 %v3328_v49, %v569_v47 }
 0x167   :  { %v625_v18 = vadd.f32 %v3342_v21, %v571_v44  ;;  %v3872_v44 = vmov 2  }
 0x215   :  { %v989_v3 = vpop.f32.mrb[2].mxu0  ;;  %v1060_v2 = vpop.f32.mrb[2].mxu1 }
 0x216   :  { %v1065_v30 = vadd.f32 %v989_v3, %v622_v63  ;;  %v991_v61 = vpop.f32.mrb[3].mxu0  ;;  %v1062_v34 = vpop.f32.mrb[3].mxu1  ;;  %v1067_v43 = vadd.f32 %v1060_v2, %v624_v6  ;;  %v3866_v6 = vld [vmem:[#allocation17_spill] sm:$0xff] }
 0x217   :  { %v1066_v38 = vadd.f32 %v991_v61, %v623_v0  ;;  %v1068_v12 = vadd.f32 %v1062_v34, %v625_v18  ;;  %v3867_v61 = vld [vmem:[#allocation18_spill] sm:$0xff]  ;;  %v3868_v34 = vld [vmem:[#allocation19_spill] sm:$0xff]  ;;  %v3873_v18 = vmov 0  }
 0x218   :  { %2864 = vtanh.f32 %v1065_v30 }
 0x219   :  { %2866 = vtanh.f32 %v1066_v38  ;;  %v3870_v38 = vld [vmem:[#allocation14_spill] sm:$0xff] }
 0x21a   :  { %2868 = vtanh.f32 %v1067_v43  ;;  %v83_v43 = vld [vmem:[%s3771_s0 + $0x18] sm:$0xff] }
 0x21b   :  { %2870 = vtanh.f32 %v1068_v12  ;;  %107 = vperm.xlu1 %2834, %v83_v43   ;;  %213 = vperm.xlu0 %2835, %v83_v43   ;;  %v3874_v12 = vmov 3  }
 0x21f   :  { %2836 = vset.pattern.permute.xlu1 %v3872_v44  ;;  %2838 = vset.pattern.permute.xlu0 %v3873_v18 }
 0x220   :  { %345 = vperm.xlu1 %2836, %v83_v43  }
 0x222   :  { %v2865_v36 = vpop.eup %2864 }
 0x223   :  { %v1073_v51 = vmul.f32 0.5, %v2865_v36  ;;  %v2867_v39 = vpop.eup %2866  ;;  %v3875_v36 = vmov 1  }
 0x224   :  { %v1074_v14 = vmul.f32 0.5, %v2867_v39  ;;  %v2869_v27 = vpop.eup %2868  ;;  %2837 = vset.pattern.permute.xlu1 %v3874_v12  ;;  %v3881_v12 = vld [vmem:[#allocation27_spill] sm:$0xff] }
 0x225   :  { %v1075_v3 = vadd.f32 0.5, %v1073_v51  ;;  %v2871_v50 = vpop.eup %2870  ;;  %477 = vperm.xlu1 %2837, %v83_v43   ;;  %v103_v51 = vpop.permute.xlu1 %102 }
 0x226   :  { %v1076_v60 = vadd.f32 0.5, %v1074_v14  ;;  %v1077_v63 = vmul.f32 0.5, %v2871_v50  ;;  %v3879_v50 = vld [vmem:[#allocation24_spill] sm:$0xff] }
 0x227   :  { %v1080_v47 = vmul.f32 %v2869_v27, %v1075_v3  ;;  %v3876_v3 = vld [vmem:[#allocation21_spill] sm:$0xff]  ;;  %v3877_v27 = vld [vmem:[#allocation22_spill] sm:$0xff] }
 0x228   :  { %v1079_v16 = vmul.f32 %v1076_v60, %v3345_v62  ;;  %v1078_v2 = vadd.f32 0.5, %v1077_v63  ;;  %v3865_v62 = vld [vmem:[#allocation16_spill] sm:$0xff]  ;;  %v176_v14 = vmul.f32 %v3876_v3, %v103_v51 }
 0x229   :  { %2839 = vset.pattern.permute.xlu1 %v3875_v36  ;;  %v210_v39 = vpop.permute.xlu1 %209  ;;  %v3882_v36 = vld [vmem:[#allocation28_spill] sm:$0xff] }
 0x22a   :  { %v3410_v52 = vadd.f32 %v1080_v47, %v1079_v16  ;;  %v276_v60 = vmul.f32 %v3877_v27, %v210_v39  ;;  %v3878_v47 = vld [vmem:[#allocation23_spill] sm:$0xff]  ;;  %v277_v63 = vmul.f32 %v3879_v50, %v210_v39  ;;  %v278_v18 = vmul.f32 %v3861_v8, %v210_v39  ;;  %v3883_v27 = vld [vmem:[#allocation30_spill] sm:$0xff] }
 0x22b   :  { %v177_v16 = vmul.f32 %v3878_v47, %v103_v51 }
 0x22c   :  { %2872 = vtanh.f32 %v3410_v52  ;;  %v308_v44 = vadd.f32 %v276_v60, %v176_v14  ;;  %v179_v14 = vmul.f32 %v3308_v9, %v103_v51  ;;  %v279_v60 = vmul.f32 %v3311_v1, %v210_v39 }
 0x236   :  { %v2873_v0 = vpop.eup %2872 }
 0x237   :  { %v1083_v30 = vmul.f32 %v2873_v0, %v1078_v2  ;;  %v342_v2 = vpop.permute.xlu0 %341  ;;  %v3880_v0 = vld [vmem:[#allocation25_spill] sm:$0xff] }
 0x238   :  { %v408_v43 = vmul.f32 %v3881_v12, %v342_v2  ;;  %v410_v3 = vmul.f32 %v3290_v31, %v342_v2  ;;  %v311_v12 = vadd.f32 %v279_v60, %v179_v14 }
 0x239   :  { %1156 = vmatmul.mubr.f32.vlgmr.msra.gmra.mrb[4].mxu0 %v1083_v30  ;;  %1227 = vmatmul.mubr.f32.vlgmr.msra.gmra.mrb[4].mxu1 %v1083_v30  ;;  %v178_v30 = vmul.f32 %v3880_v0, %v103_v51 }
 0x23a   :  { %2468 = vmatpush1.bf16.msra.mxu0 %v3087_v11  ;;  %2500 = vmatpush1.bf16.msra.mxu1 %v3090_v15  ;;  %v440_v47 = vadd.f32 %v408_v43, %v308_v44 }
 0x23b   :  { %2470 = vmatprep.subr.bf16.mxu0 %v3094_v19  ;;  %2502 = vmatprep.subr.bf16.mxu1 %v3096_v20 }
 0x23c   :  { %1323 = vmatprep.mubr.f32.mxu0 %v3849_v23  ;;  %1394 = vmatprep.mubr.f32.mxu1 %v3849_v23 }
 0x23e   :  { %2472 = vmatpush1.bf16.msra.mxu0 %v3099_v24  ;;  %2504 = vmatpush1.bf16.msra.mxu1 %v3103_v28 }
 0x23f   :  { %2474 = vmatprep.subr.bf16.mxu0 %v3105_v29  ;;  %2506 = vmatprep.subr.bf16.mxu1 %v3107_v33 }
 0x242   :  { %2476 = vmatpush1.bf16.msra.mxu0 %v3110_v37  ;;  %2508 = vmatpush1.bf16.msra.mxu1 %v3114_v41 }
 0x243   :  { %2478 = vmatprep.subr.bf16.mxu0 %v3116_v42  ;;  %2510 = vmatprep.subr.bf16.mxu1 %v3119_v46 }
 0x246   :  { %2480 = vmatpush1.bf16.msra.mxu0 %v3122_v53  ;;  %2512 = vmatpush1.bf16.msra.mxu1 %v3126_v54 }
 0x247   :  { %2482 = vmatprep.subr.bf16.mxu0 %v3128_v55  ;;  %2514 = vmatprep.subr.bf16.mxu1 %v3131_v59 }
 0x24a   :  { %2484 = vmatpush1.bf16.msra.mxu0 %v3134_v4  ;;  %2516 = vmatpush1.bf16.msra.mxu1 %v3138_v5 }
 0x24b   :  { %2486 = vmatprep.subr.bf16.mxu0 %v3140_v7  ;;  %2518 = vmatprep.subr.bf16.mxu1 %v3143_v13 }
 0x24e   :  { %2488 = vmatpush1.bf16.msra.mxu0 %v3146_v22  ;;  %2520 = vmatpush1.bf16.msra.mxu1 %v3150_v25 }
 0x24f   :  { %2490 = vmatprep.subr.bf16.mxu0 %v3152_v26  ;;  %2522 = vmatprep.subr.bf16.mxu1 %v3158_v32 }
 0x252   :  { %2492 = vmatpush1.bf16.msra.mxu0 %v3161_v40  ;;  %2524 = vmatpush1.bf16.msra.mxu1 %v3865_v62 }
 0x253   :  { %2494 = vmatprep.subr.bf16.mxu0 %v3866_v6  ;;  %2526 = vmatprep.subr.bf16.mxu1 %v3867_v61 }
 0x256   :  { %2496 = vmatpush1.bf16.msra.mxu0 %v3868_v34  ;;  %2528 = vmatpush1.bf16.msra.mxu1 %v3869_v35  ;;  %v474_v35 = vpop.permute.xlu1 %473  ;;  %v310_v34 = vadd.f32 %v278_v18, %v178_v30  ;;  %v411_v18 = vmul.f32 %v3320_v10, %v342_v2 }
 0x257   :  { %2530 = vmatprep.subr.bf16.mxu0 %v3870_v38  ;;  %2562 = vmatprep.subr.bf16.mxu1 %v3871_v56  ;;  %v309_v56 = vadd.f32 %v277_v63, %v177_v16  ;;  %v409_v38 = vmul.f32 %v3882_v36, %v342_v2  ;;  %v540_v61 = vmul.f32 %v3883_v27, %v474_v35 }
 0x258   :  { %v541_v50 = vmul.f32 %v3864_v48, %v474_v35  ;;  %v542_v0 = vmul.f32 %v3305_v57, %v474_v35  ;;  %v442_v62 = vadd.f32 %v410_v3, %v310_v34  ;;  %v543_v51 = vmul.f32 %v3335_v17, %v474_v35 }
 0x259   :  { %v441_v6 = vadd.f32 %v409_v38, %v309_v56  ;;  %v572_v16 = vadd.f32 %v540_v61, %v440_v47  ;;  %v443_v61 = vadd.f32 %v411_v18, %v311_v12 }
 0x25a   :  { %v574_v36 = vadd.f32 %v542_v0, %v442_v62 }
 0x25b   :  { %v573_v63 = vadd.f32 %v541_v50, %v441_v6  ;;  %v626_v30 = vadd.f32 %v3325_v45, %v572_v16  ;;  %v575_v6 = vadd.f32 %v543_v51, %v443_v61  ;;  %v3888_v51 = vld [vmem:[#allocation20_spill] sm:$0xff]  ;;  %v3890_v61 = vld [vmem:[#allocation15_spill] sm:$0xff] }
 0x25c   :  { %v628_v56 = vadd.f32 %v3331_v58, %v574_v36 }
 0x25d   :  { %v627_v43 = vadd.f32 %v3328_v49, %v573_v63  ;;  %v629_v47 = vadd.f32 %v3342_v21, %v575_v6  ;;  %v3891_v6 = vmov 2  }
 0x30c   :  { %v1157_v27 = vpop.f32.mrb[4].mxu0  ;;  %v1228_v44 = vpop.f32.mrb[4].mxu1 }
 0x30d   :  { %v1233_v38 = vadd.f32 %v1157_v27, %v626_v30  ;;  %v1159_v34 = vpop.f32.mrb[5].mxu0  ;;  %v1230_v3 = vpop.f32.mrb[5].mxu1  ;;  %v1235_v62 = vadd.f32 %v1228_v44, %v628_v56  ;;  %v3885_v56 = vld [vmem:[#allocation17_spill] sm:$0xff] }
 0x30e   :  { %v1234_v39 = vadd.f32 %v1159_v34, %v627_v43  ;;  %v1236_v50 = vadd.f32 %v1230_v3, %v629_v47  ;;  %v3886_v34 = vld [vmem:[#allocation18_spill] sm:$0xff]  ;;  %v3887_v3 = vld [vmem:[#allocation19_spill] sm:$0xff]  ;;  %v3892_v47 = vmov 3  }
 0x30f   :  { %2874 = vtanh.f32 %v1233_v38 }
 0x310   :  { %2876 = vtanh.f32 %v1234_v39  ;;  %v3889_v39 = vld [vmem:[#allocation14_spill] sm:$0xff] }
 0x311   :  { %2878 = vtanh.f32 %v1235_v62  ;;  %v84_v62 = vld [vmem:[%s3771_s0 + $0x20] sm:$0xff] }
 0x312   :  { %2880 = vtanh.f32 %v1236_v50  ;;  %217 = vperm.xlu1 %2839, %v84_v62   ;;  %112 = vperm.xlu0 %2838, %v84_v62   ;;  %v3893_v50 = vmov 0  }
 0x316   :  { %2840 = vset.pattern.permute.xlu1 %v3891_v6  ;;  %2841 = vset.pattern.permute.xlu0 %v3892_v47 }
 0x317   :  { %349 = vperm.xlu1 %2840, %v84_v62   ;;  %481 = vperm.xlu0 %2841, %v84_v62   ;;  %v3899_v62 = vld [vmem:[#allocation27_spill] sm:$0xff] }
 0x319   :  { %v2875_v2 = vpop.eup %2874 }
 0x31a   :  { %v1241_v0 = vmul.f32 0.5, %v2875_v2  ;;  %v2877_v14 = vpop.eup %2876  ;;  %v108_v2 = vpop.permute.xlu1 %107 }
 0x31b   :  { %v1242_v60 = vmul.f32 0.5, %v2877_v14  ;;  %v2879_v36 = vpop.eup %2878  ;;  %2842 = vset.pattern.permute.xlu1 %v3893_v50  ;;  %2844 = vset.pattern.permute.xlu0 %v3891_v6 }
 0x31c   :  { %v1243_v27 = vadd.f32 0.5, %v1241_v0  ;;  %v2881_v18 = vpop.eup %2880  ;;  %v214_v0 = vpop.permute.xlu0 %213 }
 0x31d   :  { %v1244_v16 = vadd.f32 0.5, %v1242_v60  ;;  %v1245_v30 = vmul.f32 0.5, %v2881_v18  ;;  %v3897_v18 = vld [vmem:[#allocation24_spill] sm:$0xff] }
 0x31e   :  { %v1248_v63 = vmul.f32 %v2879_v36, %v1243_v27  ;;  %v346_v14 = vpop.permute.xlu1 %345  ;;  %v3894_v27 = vld [vmem:[#allocation21_spill] sm:$0xff]  ;;  %v3895_v36 = vld [vmem:[#allocation22_spill] sm:$0xff] }
 0x31f   :  { %v1247_v35 = vmul.f32 %v1244_v16, %v3410_v52  ;;  %v1246_v44 = vadd.f32 0.5, %v1245_v30  ;;  %v3884_v52 = vld [vmem:[#allocation16_spill] sm:$0xff]  ;;  %v180_v60 = vmul.f32 %v3894_v27, %v108_v2  ;;  %v280_v16 = vmul.f32 %v3895_v36, %v214_v0 }
 0x320   :  { %v281_v30 = vmul.f32 %v3897_v18, %v214_v0  ;;  %v412_v47 = vmul.f32 %v3899_v62, %v346_v14 }
 0x321   :  { %v3475_v12 = vadd.f32 %v1248_v63, %v1247_v35  ;;  %v3896_v63 = vld [vmem:[#allocation23_spill] sm:$0xff]  ;;  %v312_v50 = vadd.f32 %v280_v16, %v180_v60  ;;  %v283_v60 = vmul.f32 %v3311_v1, %v214_v0 }
 0x322   :  { %v181_v35 = vmul.f32 %v3896_v63, %v108_v2 }
 0x323   :  { %2882 = vtanh.f32 %v3475_v12 }
 0x32d   :  { %v2883_v43 = vpop.eup %2882 }
 0x32e   :  { %v1251_v38 = vmul.f32 %v2883_v43, %v1246_v44  ;;  %v3898_v44 = vld [vmem:[#allocation25_spill] sm:$0xff] }
 0x32f   :  { %v182_v43 = vmul.f32 %v3898_v44, %v108_v2 }
 0x330   :  { %1324 = vmatmul.mubr.f32.vlgmr.msra.gmra.mrb[6].mxu0 %v1251_v38  ;;  %1395 = vmatmul.mubr.f32.vlgmr.msra.gmra.mrb[6].mxu1 %v1251_v38  ;;  %v282_v38 = vmul.f32 %v3861_v8, %v214_v0  ;;  %v183_v8 = vmul.f32 %v3308_v9, %v108_v2 }
 0x331   :  { %2532 = vmatpush1.bf16.msra.mxu0 %v3087_v11  ;;  %2564 = vmatpush1.bf16.msra.mxu1 %v3090_v15 }
 0x332   :  { %2534 = vmatprep.subr.bf16.mxu0 %v3094_v19  ;;  %2566 = vmatprep.subr.bf16.mxu1 %v3096_v20  ;;  %v314_v27 = vadd.f32 %v282_v38, %v182_v43 }
 0x333   :  { %1491 = vmatprep.mubr.f32.mxu0 %v3849_v23  ;;  %1562 = vmatprep.mubr.f32.mxu1 %v3849_v23 }
 0x335   :  { %2536 = vmatpush1.bf16.msra.mxu0 %v3099_v24  ;;  %2568 = vmatpush1.bf16.msra.mxu1 %v3103_v28 }
 0x336   :  { %2538 = vmatprep.subr.bf16.mxu0 %v3105_v29  ;;  %2570 = vmatprep.subr.bf16.mxu1 %v3107_v33 }
 0x339   :  { %2540 = vmatpush1.bf16.msra.mxu0 %v3110_v37  ;;  %2572 = vmatpush1.bf16.msra.mxu1 %v3114_v41 }
 0x33a   :  { %2542 = vmatprep.subr.bf16.mxu0 %v3116_v42  ;;  %2574 = vmatprep.subr.bf16.mxu1 %v3119_v46 }
 0x33d   :  { %2544 = vmatpush1.bf16.msra.mxu0 %v3122_v53  ;;  %2576 = vmatpush1.bf16.msra.mxu1 %v3126_v54 }
 0x33e   :  { %2546 = vmatprep.subr.bf16.mxu0 %v3128_v55  ;;  %2578 = vmatprep.subr.bf16.mxu1 %v3131_v59 }
 0x341   :  { %2548 = vmatpush1.bf16.msra.mxu0 %v3134_v4  ;;  %2580 = vmatpush1.bf16.msra.mxu1 %v3138_v5 }
 0x342   :  { %2550 = vmatprep.subr.bf16.mxu0 %v3140_v7  ;;  %2582 = vmatprep.subr.bf16.mxu1 %v3143_v13 }
 0x345   :  { %2552 = vmatpush1.bf16.msra.mxu0 %v3146_v22  ;;  %2584 = vmatpush1.bf16.msra.mxu1 %v3150_v25 }
 0x346   :  { %2554 = vmatprep.subr.bf16.mxu0 %v3152_v26  ;;  %2586 = vmatprep.subr.bf16.mxu1 %v3158_v32 }
 0x349   :  { %2556 = vmatpush1.bf16.msra.mxu0 %v3161_v40  ;;  %2588 = vmatpush1.bf16.msra.mxu1 %v3884_v52 }
 0x34a   :  { %2558 = vmatprep.subr.bf16.mxu0 %v3885_v56  ;;  %2590 = vmatprep.subr.bf16.mxu1 %v3886_v34  ;;  %v3901_v34 = vld [vmem:[#allocation30_spill] sm:$0xff]  ;;  %v444_v56 = vadd.f32 %v412_v47, %v312_v50 }
 0x34d   :  { %2560 = vmatpush1.bf16.msra.mxu0 %v3887_v3  ;;  %2592 = vmatpush1.bf16.msra.mxu1 %v3888_v51  ;;  %v478_v51 = vpop.permute.xlu1 %477  ;;  %v414_v3 = vmul.f32 %v3290_v31, %v346_v14  ;;  %v315_v31 = vadd.f32 %v283_v60, %v183_v8 }
 0x34e   :  { %2594 = vmatprep.subr.bf16.mxu0 %v3889_v39  ;;  %2626 = vmatprep.subr.bf16.mxu1 %v3890_v61  ;;  %v3900_v61 = vld [vmem:[#allocation28_spill] sm:$0xff]  ;;  %v313_v39 = vadd.f32 %v281_v30, %v181_v35  ;;  %v544_v36 = vmul.f32 %v3901_v34, %v478_v51  ;;  %v545_v63 = vmul.f32 %v3864_v48, %v478_v51 }
 0x34f   :  { %v413_v6 = vmul.f32 %v3900_v61, %v346_v14  ;;  %v546_v44 = vmul.f32 %v3305_v57, %v478_v51  ;;  %v446_v52 = vadd.f32 %v414_v3, %v314_v27  ;;  %v415_v30 = vmul.f32 %v3320_v10, %v346_v14 }
 0x350   :  { %v576_v16 = vadd.f32 %v544_v36, %v444_v56  ;;  %v547_v2 = vmul.f32 %v3335_v17, %v478_v51 }
 0x351   :  { %v445_v18 = vadd.f32 %v413_v6, %v313_v39  ;;  %v578_v35 = vadd.f32 %v546_v44, %v446_v52  ;;  %v447_v56 = vadd.f32 %v415_v30, %v315_v31 }
 0x352   :  { %v630_v43 = vadd.f32 %v3325_v45, %v576_v16 }
 0x353   :  { %v577_v61 = vadd.f32 %v545_v63, %v445_v18  ;;  %v632_v6 = vadd.f32 %v3331_v58, %v578_v35  ;;  %v579_v14 = vadd.f32 %v547_v2, %v447_v56  ;;  %v3906_v2 = vld [vmem:[#allocation20_spill] sm:$0xff]  ;;  %v3908_v56 = vld [vmem:[#allocation15_spill] sm:$0xff] }
 0x355   :  { %v631_v50 = vadd.f32 %v3328_v49, %v577_v61  ;;  %v633_v8 = vadd.f32 %v3342_v21, %v579_v14  ;;  %v3909_v14 = vmov 1  }
 0x403   :  { %v1325_v38 = vpop.f32.mrb[6].mxu0  ;;  %v1396_v47 = vpop.f32.mrb[6].mxu1 }
 0x404   :  { %v1401_v39 = vadd.f32 %v1325_v38, %v630_v43  ;;  %v1327_v3 = vpop.f32.mrb[7].mxu0  ;;  %v1398_v27 = vpop.f32.mrb[7].mxu1  ;;  %v1403_v52 = vadd.f32 %v1396_v47, %v632_v6  ;;  %v3903_v6 = vld [vmem:[#allocation17_spill] sm:$0xff] }
 0x405   :  { %v1402_v0 = vadd.f32 %v1327_v3, %v631_v50  ;;  %v1404_v36 = vadd.f32 %v1398_v27, %v633_v8  ;;  %v3904_v3 = vld [vmem:[#allocation18_spill] sm:$0xff]  ;;  %v3905_v27 = vld [vmem:[#allocation19_spill] sm:$0xff]  ;;  %v3910_v8 = vmov 3  }
 0x406   :  { %2884 = vtanh.f32 %v1401_v39 }
 0x407   :  { %2886 = vtanh.f32 %v1402_v0  ;;  %v3907_v0 = vld [vmem:[#allocation14_spill] sm:$0xff] }
 0x408   :  { %2888 = vtanh.f32 %v1403_v52  ;;  %v85_v52 = vld [vmem:[%s3771_s0 + $0x28] sm:$0xff] }
 0x409   :  { %2890 = vtanh.f32 %v1404_v36  ;;  %117 = vperm.xlu1 %2842, %v85_v52   ;;  %353 = vperm.xlu0 %2844, %v85_v52   ;;  %v3911_v36 = vmov 0  }
 0x40d   :  { %2843 = vset.pattern.permute.xlu1 %v3909_v14  ;;  %2847 = vset.pattern.permute.xlu0 %v3909_v14 }
 0x40e   :  { %221 = vperm.xlu1 %2843, %v85_v52  }
 0x410   :  { %v2885_v63 = vpop.eup %2884 }
 0x411   :  { %v1409_v18 = vmul.f32 0.5, %v2885_v63  ;;  %v2887_v61 = vpop.eup %2886  ;;  %v218_v63 = vpop.permute.xlu1 %217 }
 0x412   :  { %v1410_v60 = vmul.f32 0.5, %v2887_v61  ;;  %v2889_v16 = vpop.eup %2888  ;;  %2845 = vset.pattern.permute.xlu1 %v3910_v8  ;;  %v3912_v61 = vld [vmem:[#allocation22_spill] sm:$0xff] }
 0x413   :  { %v1411_v44 = vadd.f32 0.5, %v1409_v18  ;;  %v2891_v30 = vpop.eup %2890  ;;  %485 = vperm.xlu1 %2845, %v85_v52   ;;  %v113_v18 = vpop.permute.xlu0 %112 }
 0x414   :  { %v1412_v35 = vadd.f32 0.5, %v1410_v60  ;;  %v1413_v38 = vmul.f32 0.5, %v2891_v30  ;;  %v3913_v60 = vld [vmem:[#allocation21_spill] sm:$0xff] }
 0x415   :  { %v1416_v43 = vmul.f32 %v2889_v16, %v1411_v44  ;;  %v284_v44 = vmul.f32 %v3912_v61, %v218_v63  ;;  %v184_v16 = vmul.f32 %v3913_v60, %v113_v18  ;;  %v3919_v61 = vld [vmem:[#allocation29_spill] sm:$0xff] }
 0x416   :  { %v1415_v51 = vmul.f32 %v1412_v35, %v3475_v12  ;;  %v1414_v47 = vadd.f32 0.5, %v1413_v38  ;;  %v3902_v12 = vld [vmem:[#allocation16_spill] sm:$0xff]  ;;  %v350_v38 = vpop.permute.xlu1 %349 }
 0x417   :  { %2846 = vset.pattern.permute.xlu1 %v3911_v36  ;;  %v3914_v35 = vld [vmem:[#allocation24_spill] sm:$0xff]  ;;  %v416_v52 = vmul.f32 %v3899_v62, %v350_v38 }
 0x418   :  { %v3540_v31 = vadd.f32 %v1416_v43, %v1415_v51  ;;  %v285_v43 = vmul.f32 %v3914_v35, %v218_v63  ;;  %v3915_v51 = vld [vmem:[#allocation23_spill] sm:$0xff]  ;;  %v3918_v36 = vld [vmem:[#allocation28_spill] sm:$0xff] }
 0x419   :  { %v185_v30 = vmul.f32 %v3915_v51, %v113_v18 }
 0x41a   :  { %2892 = vtanh.f32 %v3540_v31 }
 0x41b   :  { %v317_v8 = vadd.f32 %v285_v43, %v185_v30 }
 0x424   :  { %v2893_v50 = vpop.eup %2892 }
 0x425   :  { %v1419_v39 = vmul.f32 %v2893_v50, %v1414_v47  ;;  %v3916_v47 = vld [vmem:[#allocation26_spill] sm:$0xff] }
 0x426   :  { %v286_v50 = vmul.f32 %v3916_v47, %v218_v63 }
 0x427   :  { %1492 = vmatmul.mubr.f32.vlgmr.msra.gmra.mrb[8].mxu0 %v1419_v39  ;;  %1563 = vmatmul.mubr.f32.vlgmr.msra.gmra.mrb[8].mxu1 %v1419_v39  ;;  %v3917_v39 = vld [vmem:[#allocation25_spill] sm:$0xff] }
 0x428   :  { %2596 = vmatpush1.bf16.msra.mxu0 %v3087_v11  ;;  %2628 = vmatpush1.bf16.msra.mxu1 %v3090_v15  ;;  %v186_v14 = vmul.f32 %v3917_v39, %v113_v18 }
 0x429   :  { %2598 = vmatprep.subr.bf16.mxu0 %v3094_v19  ;;  %2630 = vmatprep.subr.bf16.mxu1 %v3096_v20 }
 0x42a   :  { %1659 = vmatprep.mubr.f32.mxu0 %v3849_v23  ;;  %1730 = vmatprep.mubr.f32.mxu1 %v3849_v23 }
 0x42c   :  { %2600 = vmatpush1.bf16.msra.mxu0 %v3099_v24  ;;  %2632 = vmatpush1.bf16.msra.mxu1 %v3103_v28 }
 0x42d   :  { %2602 = vmatprep.subr.bf16.mxu0 %v3105_v29  ;;  %2634 = vmatprep.subr.bf16.mxu1 %v3107_v33 }
 0x430   :  { %2604 = vmatpush1.bf16.msra.mxu0 %v3110_v37  ;;  %2636 = vmatpush1.bf16.msra.mxu1 %v3114_v41 }
 0x431   :  { %2606 = vmatprep.subr.bf16.mxu0 %v3116_v42  ;;  %2638 = vmatprep.subr.bf16.mxu1 %v3119_v46 }
 0x434   :  { %2608 = vmatpush1.bf16.msra.mxu0 %v3122_v53  ;;  %2640 = vmatpush1.bf16.msra.mxu1 %v3126_v54 }
 0x435   :  { %2610 = vmatprep.subr.bf16.mxu0 %v3128_v55  ;;  %2642 = vmatprep.subr.bf16.mxu1 %v3131_v59 }
 0x438   :  { %2612 = vmatpush1.bf16.msra.mxu0 %v3134_v4  ;;  %2644 = vmatpush1.bf16.msra.mxu1 %v3138_v5 }
 0x439   :  { %2614 = vmatprep.subr.bf16.mxu0 %v3140_v7  ;;  %2646 = vmatprep.subr.bf16.mxu1 %v3143_v13 }
 0x43c   :  { %2616 = vmatpush1.bf16.msra.mxu0 %v3146_v22  ;;  %2648 = vmatpush1.bf16.msra.mxu1 %v3150_v25 }
 0x43d   :  { %2618 = vmatprep.subr.bf16.mxu0 %v3152_v26  ;;  %2650 = vmatprep.subr.bf16.mxu1 %v3158_v32 }
 0x440   :  { %2620 = vmatpush1.bf16.msra.mxu0 %v3161_v40  ;;  %2652 = vmatpush1.bf16.msra.mxu1 %v3902_v12 }
 0x441   :  { %2622 = vmatprep.subr.bf16.mxu0 %v3903_v6  ;;  %2654 = vmatprep.subr.bf16.mxu1 %v3904_v3  ;;  %v418_v3 = vmul.f32 %v3919_v61, %v350_v38 }
 0x444   :  { %2624 = vmatpush1.bf16.msra.mxu0 %v3905_v27  ;;  %2656 = vmatpush1.bf16.msra.mxu1 %v3906_v2  ;;  %v482_v2 = vpop.permute.xlu0 %481  ;;  %v318_v27 = vadd.f32 %v286_v50, %v186_v14  ;;  %v419_v14 = vmul.f32 %v3320_v10, %v350_v38 }
 0x445   :  { %2658 = vmatprep.subr.bf16.mxu0 %v3907_v0  ;;  %2690 = vmatprep.subr.bf16.mxu1 %v3908_v56  ;;  %v316_v56 = vadd.f32 %v284_v44, %v184_v16  ;;  %v417_v0 = vmul.f32 %v3918_v36, %v350_v38  ;;  %v548_v60 = vmul.f32 %v3901_v34, %v482_v2 }
 0x446   :  { %v549_v51 = vmul.f32 %v3864_v48, %v482_v2  ;;  %v550_v47 = vmul.f32 %v3305_v57, %v482_v2  ;;  %v450_v12 = vadd.f32 %v418_v3, %v318_v27  ;;  %v287_v44 = vmul.f32 %v3311_v1, %v218_v63 }
 0x447   :  { %v448_v35 = vadd.f32 %v416_v52, %v316_v56  ;;  %v449_v6 = vadd.f32 %v417_v0, %v317_v8  ;;  %v187_v16 = vmul.f32 %v3308_v9, %v113_v18  ;;  %v551_v63 = vmul.f32 %v3335_v17, %v482_v2 }
 0x448   :  { %v582_v36 = vadd.f32 %v550_v47, %v450_v12 }
 0x449   :  { %v580_v43 = vadd.f32 %v548_v60, %v448_v35  ;;  %v581_v30 = vadd.f32 %v549_v51, %v449_v6  ;;  %v319_v62 = vadd.f32 %v287_v44, %v187_v16 }
 0x44a   :  { %v636_v8 = vadd.f32 %v3331_v58, %v582_v36 }
 0x44b   :  { %v634_v50 = vadd.f32 %v3325_v45, %v580_v43  ;;  %v635_v52 = vadd.f32 %v3328_v49, %v581_v30  ;;  %v451_v60 = vadd.f32 %v419_v14, %v319_v62 }
 0x44d   :  { %v583_v6 = vadd.f32 %v551_v63, %v451_v60  ;;  %v3924_v63 = vld [vmem:[#allocation20_spill] sm:$0xff]  ;;  %v3926_v60 = vld [vmem:[#allocation15_spill] sm:$0xff] }
 0x44f   :  { %v637_v35 = vadd.f32 %v3342_v21, %v583_v6  ;;  %v3927_v6 = vmov 2  }
 0x4fa   :  { %v1493_v34 = vpop.f32.mrb[8].mxu0  ;;  %v1564_v56 = vpop.f32.mrb[8].mxu1 }
 0x4fb   :  { %v1569_v0 = vadd.f32 %v1493_v34, %v634_v50  ;;  %v1495_v3 = vpop.f32.mrb[9].mxu0  ;;  %v1566_v27 = vpop.f32.mrb[9].mxu1  ;;  %v1571_v12 = vadd.f32 %v1564_v56, %v636_v8  ;;  %v3921_v8 = vld [vmem:[#allocation17_spill] sm:$0xff] }
 0x4fc   :  { %v1570_v18 = vadd.f32 %v1495_v3, %v635_v52  ;;  %v1572_v51 = vadd.f32 %v1566_v27, %v637_v35  ;;  %v3922_v3 = vld [vmem:[#allocation18_spill] sm:$0xff]  ;;  %v3923_v27 = vld [vmem:[#allocation19_spill] sm:$0xff]  ;;  %v3928_v35 = vmov 0  }
 0x4fd   :  { %2894 = vtanh.f32 %v1569_v0 }
 0x4fe   :  { %2896 = vtanh.f32 %v1570_v18  ;;  %v3925_v18 = vld [vmem:[#allocation14_spill] sm:$0xff] }
 0x4ff   :  { %2898 = vtanh.f32 %v1571_v12  ;;  %v86_v12 = vld [vmem:[%s3771_s0 + $0x30] sm:$0xff] }
 0x500   :  { %2900 = vtanh.f32 %v1572_v51  ;;  %122 = vperm.xlu1 %2846, %v86_v12   ;;  %225 = vperm.xlu0 %2847, %v86_v12   ;;  %v3929_v51 = vmov 3  }
 0x504   :  { %2848 = vset.pattern.permute.xlu1 %v3927_v6  ;;  %2850 = vset.pattern.permute.xlu0 %v3928_v35  ;;  %v3936_v35 = vld [vmem:[#allocation27_spill] sm:$0xff] }
 0x505   :  { %357 = vperm.xlu1 %2848, %v86_v12  }
 0x507   :  { %v2895_v38 = vpop.eup %2894 }
 0x508   :  { %v1577_v47 = vmul.f32 0.5, %v2895_v38  ;;  %v2897_v44 = vpop.eup %2896  ;;  %v3930_v38 = vmov 1  }
 0x509   :  { %v1578_v16 = vmul.f32 0.5, %v2897_v44  ;;  %v2899_v36 = vpop.eup %2898  ;;  %2849 = vset.pattern.permute.xlu1 %v3929_v51 }
 0x50a   :  { %v1579_v34 = vadd.f32 0.5, %v1577_v47  ;;  %v2901_v14 = vpop.eup %2900  ;;  %489 = vperm.xlu1 %2849, %v86_v12   ;;  %v118_v47 = vpop.permute.xlu1 %117 }
 0x50b   :  { %v1580_v43 = vadd.f32 0.5, %v1578_v16  ;;  %v1581_v50 = vmul.f32 0.5, %v2901_v14  ;;  %v3934_v14 = vld [vmem:[#allocation24_spill] sm:$0xff] }
 0x50c   :  { %v1584_v30 = vmul.f32 %v2899_v36, %v1579_v34  ;;  %v3931_v34 = vld [vmem:[#allocation21_spill] sm:$0xff]  ;;  %v3932_v36 = vld [vmem:[#allocation22_spill] sm:$0xff] }
 0x50d   :  { %v1583_v2 = vmul.f32 %v1580_v43, %v3540_v31  ;;  %v1582_v56 = vadd.f32 0.5, %v1581_v50  ;;  %v3920_v31 = vld [vmem:[#allocation16_spill] sm:$0xff]  ;;  %v188_v16 = vmul.f32 %v3931_v34, %v118_v47 }
 0x50e   :  { %2851 = vset.pattern.permute.xlu1 %v3930_v38  ;;  %v222_v44 = vpop.permute.xlu1 %221  ;;  %v3937_v38 = vld [vmem:[#allocation28_spill] sm:$0xff] }
 0x50f   :  { %v3605_v62 = vadd.f32 %v1584_v30, %v1583_v2  ;;  %v288_v43 = vmul.f32 %v3932_v36, %v222_v44  ;;  %v3933_v30 = vld [vmem:[#allocation23_spill] sm:$0xff]  ;;  %v289_v50 = vmul.f32 %v3934_v14, %v222_v44  ;;  %v3938_v36 = vld [vmem:[#allocation30_spill] sm:$0xff] }
 0x510   :  { %v189_v2 = vmul.f32 %v3933_v30, %v118_v47 }
 0x511   :  { %2902 = vtanh.f32 %v3605_v62 }
 0x512   :  { %v321_v51 = vadd.f32 %v289_v50, %v189_v2 }
 0x51b   :  { %v2903_v52 = vpop.eup %2902 }
 0x51c   :  { %v1587_v0 = vmul.f32 %v2903_v52, %v1582_v56  ;;  %v354_v56 = vpop.permute.xlu0 %353  ;;  %v190_v52 = vmul.f32 %v3917_v39, %v118_v47 }
 0x51d   :  { %v420_v12 = vmul.f32 %v3936_v35, %v354_v56  ;;  %v421_v6 = vmul.f32 %v3937_v38, %v354_v56  ;;  %v422_v34 = vmul.f32 %v3919_v61, %v354_v56 }
 0x51e   :  { %1660 = vmatmul.mubr.f32.vlgmr.msra.gmra.mrb[10].mxu0 %v1587_v0  ;;  %1731 = vmatmul.mubr.f32.vlgmr.msra.gmra.mrb[10].mxu1 %v1587_v0  ;;  %v3935_v0 = vld [vmem:[#allocation26_spill] sm:$0xff] }
 0x51f   :  { %2660 = vmatpush1.bf16.msra.mxu0 %v3087_v11  ;;  %2692 = vmatpush1.bf16.msra.mxu1 %v3090_v15 }
 0x520   :  { %2662 = vmatprep.subr.bf16.mxu0 %v3094_v19  ;;  %2694 = vmatprep.subr.bf16.mxu1 %v3096_v20 }
 0x521   :  { %1827 = vmatprep.mubr.f32.mxu0 %v3849_v23  ;;  %1898 = vmatprep.mubr.f32.mxu1 %v3849_v23 }
 0x523   :  { %2664 = vmatpush1.bf16.msra.mxu0 %v3099_v24  ;;  %2696 = vmatpush1.bf16.msra.mxu1 %v3103_v28 }
 0x524   :  { %2666 = vmatprep.subr.bf16.mxu0 %v3105_v29  ;;  %2698 = vmatprep.subr.bf16.mxu1 %v3107_v33 }
 0x527   :  { %2668 = vmatpush1.bf16.msra.mxu0 %v3110_v37  ;;  %2700 = vmatpush1.bf16.msra.mxu1 %v3114_v41 }
 0x528   :  { %2670 = vmatprep.subr.bf16.mxu0 %v3116_v42  ;;  %2702 = vmatprep.subr.bf16.mxu1 %v3119_v46 }
 0x52b   :  { %2672 = vmatpush1.bf16.msra.mxu0 %v3122_v53  ;;  %2704 = vmatpush1.bf16.msra.mxu1 %v3126_v54 }
 0x52c   :  { %2674 = vmatprep.subr.bf16.mxu0 %v3128_v55  ;;  %2706 = vmatprep.subr.bf16.mxu1 %v3131_v59 }
 0x52f   :  { %2676 = vmatpush1.bf16.msra.mxu0 %v3134_v4  ;;  %2708 = vmatpush1.bf16.msra.mxu1 %v3138_v5 }
 0x530   :  { %2678 = vmatprep.subr.bf16.mxu0 %v3140_v7  ;;  %2710 = vmatprep.subr.bf16.mxu1 %v3143_v13 }
 0x533   :  { %2680 = vmatpush1.bf16.msra.mxu0 %v3146_v22  ;;  %2712 = vmatpush1.bf16.msra.mxu1 %v3150_v25 }
 0x534   :  { %2682 = vmatprep.subr.bf16.mxu0 %v3152_v26  ;;  %2714 = vmatprep.subr.bf16.mxu1 %v3158_v32 }
 0x537   :  { %2684 = vmatpush1.bf16.msra.mxu0 %v3161_v40  ;;  %2716 = vmatpush1.bf16.msra.mxu1 %v3920_v31 }
 0x538   :  { %2686 = vmatprep.subr.bf16.mxu0 %v3921_v8  ;;  %2718 = vmatprep.subr.bf16.mxu1 %v3922_v3  ;;  %v453_v8 = vadd.f32 %v421_v6, %v321_v51 }
 0x53b   :  { %2688 = vmatpush1.bf16.msra.mxu0 %v3923_v27  ;;  %2720 = vmatpush1.bf16.msra.mxu1 %v3924_v63  ;;  %v486_v63 = vpop.permute.xlu1 %485 }
 0x53c   :  { %2722 = vmatprep.subr.bf16.mxu0 %v3925_v18  ;;  %2754 = vmatprep.subr.bf16.mxu1 %v3926_v60  ;;  %v290_v18 = vmul.f32 %v3935_v0, %v222_v44  ;;  %v320_v60 = vadd.f32 %v288_v43, %v188_v16  ;;  %v552_v3 = vmul.f32 %v3938_v36, %v486_v63 }
 0x53d   :  { %v553_v14 = vmul.f32 %v3864_v48, %v486_v63  ;;  %v554_v39 = vmul.f32 %v3305_v57, %v486_v63  ;;  %v191_v16 = vmul.f32 %v3308_v9, %v118_v47  ;;  %v291_v43 = vmul.f32 %v3311_v1, %v222_v44 }
 0x53e   :  { %v322_v27 = vadd.f32 %v290_v18, %v190_v52  ;;  %v452_v30 = vadd.f32 %v420_v12, %v320_v60  ;;  %v423_v52 = vmul.f32 %v3320_v10, %v354_v56  ;;  %v555_v47 = vmul.f32 %v3335_v17, %v486_v63 }
 0x53f   :  { %v585_v50 = vadd.f32 %v553_v14, %v453_v8  ;;  %v323_v35 = vadd.f32 %v291_v43, %v191_v16 }
 0x540   :  { %v454_v31 = vadd.f32 %v422_v34, %v322_v27  ;;  %v584_v2 = vadd.f32 %v552_v3, %v452_v30 }
 0x541   :  { %v639_v12 = vadd.f32 %v3328_v49, %v585_v50  ;;  %v455_v3 = vadd.f32 %v423_v52, %v323_v35 }
 0x542   :  { %v586_v38 = vadd.f32 %v554_v39, %v454_v31  ;;  %v638_v18 = vadd.f32 %v3325_v45, %v584_v2 }
 0x543   :  { %v587_v31 = vadd.f32 %v555_v47, %v455_v3  ;;  %v3953_v3 = vld [vmem:[#allocation30_spill] sm:$0xff] }
 0x544   :  { %v640_v51 = vadd.f32 %v3331_v58, %v586_v38 }
 0x545   :  { %v641_v8 = vadd.f32 %v3342_v21, %v587_v31 }
 0x5f1   :  { %v1661_v36 = vpop.f32.mrb[10].mxu0  ;;  %v1732_v60 = vpop.f32.mrb[10].mxu1 }
 0x5f2   :  { %v1737_v6 = vadd.f32 %v1661_v36, %v638_v18  ;;  %v1663_v27 = vpop.f32.mrb[11].mxu0  ;;  %v1734_v34 = vpop.f32.mrb[11].mxu1  ;;  %v1739_v39 = vadd.f32 %v1732_v60, %v640_v51 }
 0x5f3   :  { %v1738_v44 = vadd.f32 %v1663_v27, %v639_v12  ;;  %v1740_v30 = vadd.f32 %v1734_v34, %v641_v8 }
 0x5f4   :  { %2904 = vtanh.f32 %v1737_v6 }
 0x5f5   :  { %2906 = vtanh.f32 %v1738_v44 }
 0x5f6   :  { %2908 = vtanh.f32 %v1739_v39 }
 0x5f7   :  { %2910 = vtanh.f32 %v1740_v30 }
 0x5fe   :  { %v2905_v14 = vpop.eup %2904 }
 0x5ff   :  { %v1745_v56 = vmul.f32 0.5, %v2905_v14  ;;  %v2907_v16 = vpop.eup %2906 }
 0x600   :  { %v1746_v43 = vmul.f32 0.5, %v2907_v16  ;;  %v2909_v38 = vpop.eup %2908 }
 0x601   :  { %v1747_v36 = vadd.f32 0.5, %v1745_v56  ;;  %v2911_v52 = vpop.eup %2910 }
 0x602   :  { %v1748_v2 = vadd.f32 0.5, %v1746_v43  ;;  %v1749_v18 = vmul.f32 0.5, %v2911_v52 }
 0x603   :  { %v1752_v50 = vmul.f32 %v2909_v38, %v1747_v36 }
 0x604   :  { %v1751_v63 = vmul.f32 %v1748_v2, %v3605_v62  ;;  %v1750_v60 = vadd.f32 0.5, %v1749_v18  ;;  %v3952_v62 = vld [vmem:[#allocation28_spill] sm:$0xff] }
 0x606   :  { %v3670_v35 = vadd.f32 %v1752_v50, %v1751_v63 }
 0x608   :  { %2912 = vtanh.f32 %v3670_v35 }
 0x612   :  { %v2913_v12 = vpop.eup %2912 }
 0x613   :  { %v1755_v6 = vmul.f32 %v2913_v12, %v1750_v60 }
 0x615   :  { %1828 = vmatmul.mubr.f32.vlgmr.msra.gmra.mrb[12].mxu0 %v1755_v6  ;;  %1899 = vmatmul.mubr.f32.vlgmr.msra.gmra.mrb[12].mxu1 %v1755_v6 }
 0x616   :  { %2724 = vmatpush1.bf16.msra.mxu0 %v3087_v11  ;;  %2756 = vmatpush1.bf16.msra.mxu1 %v3090_v15  ;;  %v3939_v11 = vld [vmem:[#allocation16_spill] sm:$0xff]  ;;  %v3940_v15 = vld [vmem:[#allocation17_spill] sm:$0xff] }
 0x617   :  { %2726 = vmatprep.subr.bf16.mxu0 %v3094_v19  ;;  %2758 = vmatprep.subr.bf16.mxu1 %v3096_v20  ;;  %v3941_v19 = vld [vmem:[#allocation18_spill] sm:$0xff]  ;;  %v3942_v20 = vld [vmem:[#allocation19_spill] sm:$0xff] }
 0x618   :  { %1995 = vmatprep.mubr.f32.mxu0 %v3849_v23  ;;  %2066 = vmatprep.mubr.f32.mxu1 %v3849_v23 }
 0x61a   :  { %2728 = vmatpush1.bf16.msra.mxu0 %v3099_v24  ;;  %2760 = vmatpush1.bf16.msra.mxu1 %v3103_v28  ;;  %v3943_v24 = vld [vmem:[#allocation20_spill] sm:$0xff] }
 0x61b   :  { %2730 = vmatprep.subr.bf16.mxu0 %v3105_v29  ;;  %2762 = vmatprep.subr.bf16.mxu1 %v3107_v33  ;;  %v87_v28 = vld [vmem:[%s3771_s0 + $0x38] sm:$0xff]  ;;  %v3944_v29 = vmov 2   ;;  %v3945_v33 = vmov 3  }
 0x61c   :  { %229 = vperm.xlu1 %2851, %v87_v28   ;;  %127 = vperm.xlu0 %2850, %v87_v28  }
 0x61e   :  { %2732 = vmatpush1.bf16.msra.mxu0 %v3110_v37  ;;  %2764 = vmatpush1.bf16.msra.mxu1 %v3114_v41  ;;  %v123_v37 = vpop.permute.xlu1 %122  ;;  %v226_v41 = vpop.permute.xlu0 %225 }
 0x61f   :  { %2734 = vmatprep.subr.bf16.mxu0 %v3116_v42  ;;  %2766 = vmatprep.subr.bf16.mxu1 %v3119_v46  ;;  %v3946_v46 = vld [vmem:[#allocation21_spill] sm:$0xff]  ;;  %v195_v16 = vmul.f32 %v3308_v9, %v123_v37  ;;  %v295_v36 = vmul.f32 %v3311_v1, %v226_v41 }
 0x620   :  { %2852 = vset.pattern.permute.xlu1 %v3944_v29  ;;  %2853 = vset.pattern.permute.xlu0 %v3945_v33 }
 0x621   :  { %361 = vperm.xlu1 %2852, %v87_v28   ;;  %493 = vperm.xlu0 %2853, %v87_v28   ;;  %v327_v63 = vadd.f32 %v295_v36, %v195_v16  ;;  %v2101_v36 = vld [vmem:[#allocation8 + $0x20] sm:$0xff] }
 0x622   :  { %2736 = vmatpush1.bf16.msra.mxu0 %v3122_v53  ;;  %2768 = vmatpush1.bf16.msra.mxu1 %v3126_v54  ;;  %v358_v42 = vpop.permute.xlu1 %357  ;;  %v192_v53 = vmul.f32 %v3946_v46, %v123_v37  ;;  %v3947_v54 = vld [vmem:[#allocation22_spill] sm:$0xff] }
 0x623   :  { %2738 = vmatprep.subr.bf16.mxu0 %v3128_v55  ;;  %2770 = vmatprep.subr.bf16.mxu1 %v3131_v59  ;;  %v292_v55 = vmul.f32 %v3947_v54, %v226_v41  ;;  %v3948_v59 = vld [vmem:[#allocation23_spill] sm:$0xff]  ;;  %v425_v51 = vmul.f32 %v3952_v62, %v358_v42  ;;  %v426_v47 = vmul.f32 %v3919_v61, %v358_v42 }
 0x624   :  { %v427_v50 = vmul.f32 %v3320_v10, %v358_v42 }
 0x626   :  { %2740 = vmatpush1.bf16.msra.mxu0 %v3134_v4  ;;  %2772 = vmatpush1.bf16.msra.mxu1 %v3138_v5  ;;  %v193_v4 = vmul.f32 %v3948_v59, %v123_v37  ;;  %v3949_v5 = vld [vmem:[#allocation24_spill] sm:$0xff]  ;;  %v490_v34 = vpop.permute.xlu1 %489  ;;  %v459_v28 = vadd.f32 %v427_v50, %v327_v63 }
 0x627   :  { %2742 = vmatprep.subr.bf16.mxu0 %v3140_v7  ;;  %2774 = vmatprep.subr.bf16.mxu1 %v3143_v13  ;;  %v293_v7 = vmul.f32 %v3949_v5, %v226_v41  ;;  %v3950_v13 = vld [vmem:[#allocation25_spill] sm:$0xff]  ;;  %v556_v39 = vmul.f32 %v3953_v3, %v490_v34  ;;  %v557_v8 = vmul.f32 %v3864_v48, %v490_v34  ;;  %v2104_v50 = vld [vmem:[#allocation8 + $0x38] sm:$0xff] }
 0x628   :  { %v558_v14 = vmul.f32 %v3305_v57, %v490_v34 }
 0x629   :  { %v325_v27 = vadd.f32 %v293_v7, %v193_v4 }
 0x62a   :  { %2744 = vmatpush1.bf16.msra.mxu0 %v3146_v22  ;;  %2776 = vmatpush1.bf16.msra.mxu1 %v3150_v25  ;;  %v194_v22 = vmul.f32 %v3950_v13, %v123_v37  ;;  %v294_v25 = vmul.f32 %v3935_v0, %v226_v41 }
 0x62b   :  { %2746 = vmatprep.subr.bf16.mxu0 %v3152_v26  ;;  %2778 = vmatprep.subr.bf16.mxu1 %v3158_v32  ;;  %v3951_v26 = vld [vmem:[#allocation27_spill] sm:$0xff]  ;;  %v457_v30 = vadd.f32 %v425_v51, %v325_v27 }
 0x62c   :  { %v424_v32 = vmul.f32 %v3951_v26, %v358_v42  ;;  %v326_v44 = vadd.f32 %v294_v25, %v194_v22 }
 0x62d   :  { %v589_v38 = vadd.f32 %v557_v8, %v457_v30  ;;  %v2098_v8 = vld [vmem:[#allocation8 + $0x8] sm:$0xff] }
 0x62e   :  { %2748 = vmatpush1.bf16.msra.mxu0 %v3161_v40  ;;  %2780 = vmatpush1.bf16.msra.mxu1 %v3939_v11  ;;  %v324_v40 = vadd.f32 %v292_v55, %v192_v53  ;;  %v458_v56 = vadd.f32 %v426_v47, %v326_v44 }
 0x62f   :  { %2750 = vmatprep.subr.bf16.mxu0 %v3940_v15  ;;  %2782 = vmatprep.subr.bf16.mxu1 %v3941_v19  ;;  %v643_v12 = vadd.f32 %v3328_v49, %v589_v38 }
 0x630   :  { %v456_v31 = vadd.f32 %v424_v32, %v324_v40  ;;  %v590_v2 = vadd.f32 %v558_v14, %v458_v56  ;;  %v3017_v14 = vmov 0.0|0.0   ;;  %v2099_v56 = vld [vmem:[#allocation8 + $0x10] sm:$0xff] }
 0x632   :  { %2752 = vmatpush1.bf16.msra.mxu0 %v3942_v20  ;;  %2784 = vmatpush1.bf16.msra.mxu1 %v3943_v24  ;;  %v588_v43 = vadd.f32 %v556_v39, %v456_v31  ;;  %v644_v11 = vadd.f32 %v3331_v58, %v590_v2  ;;  %v559_v20 = vmul.f32 %v3335_v17, %v490_v34  ;;  %v2097_v31 = vld [vmem:[#allocation8] sm:$0xff]  ;;  %v2103_v2 = vld [vmem:[#allocation8 + $0x30] sm:$0xff] }
 0x633   :  { %v2786_v30 = vpack.c.bf16 %v2098_v8, %v2097_v31  ;;  %2785 = vmatprep.subr.bf16.mxu0 %v3017_v14  ;;  %v2795_v63 = vpack.c.bf16 %v2104_v50, %v2103_v2 }
 0x634   :  { %v642_v52 = vadd.f32 %v3325_v45, %v588_v43  ;;  %v591_v33 = vadd.f32 %v559_v20, %v459_v28  ;;  %v2102_v43 = vld [vmem:[#allocation8 + $0x28] sm:$0xff]  ;;  %v2112_v28 = vld [vmem:[#allocation8 + $0x78] sm:$0xff] }
 0x635   :  { %v2792_v38 = vpack.c.bf16 %v2102_v43, %v2101_v36 }
 0x636   :  { %v645_v37 = vadd.f32 %v3342_v21, %v591_v33 }
 0x69b   :  { %v230_v33 = vpop.permute.xlu1 %229 }
 0x6e8   :  { %v1829_v18 = vpop.f32.mrb[12].mxu0  ;;  %v1900_v60 = vpop.f32.mrb[12].mxu1 }
 0x6e9   :  { %v1905_v6 = vadd.f32 %v1829_v18, %v642_v52  ;;  %v1831_v15 = vpop.f32.mrb[13].mxu0  ;;  %v1902_v19 = vpop.f32.mrb[13].mxu1  ;;  %v1907_v29 = vadd.f32 %v1900_v60, %v644_v11  ;;  %v2105_v52 = vld [vmem:[#allocation8 + $0x40] sm:$0xff]  ;;  %v2106_v18 = vld [vmem:[#allocation8 + $0x48] sm:$0xff] }
 0x6ea   :  { %v1906_v24 = vadd.f32 %v1831_v15, %v643_v12  ;;  %v1908_v41 = vadd.f32 %v1902_v19, %v645_v37  ;;  %v2798_v60 = vpack.c.bf16 %v2106_v18, %v2105_v52  ;;  %v2107_v12 = vld [vmem:[#allocation8 + $0x50] sm:$0xff]  ;;  %v2109_v15 = vld [vmem:[#allocation8 + $0x60] sm:$0xff]  ;;  %v2110_v19 = vld [vmem:[#allocation8 + $0x68] sm:$0xff]  ;;  %v128_v37 = vpop.permute.xlu0 %127 }
 0x6eb   :  { %2914 = vtanh.f32 %v1905_v6  ;;  %v2108_v6 = vld [vmem:[#allocation8 + $0x58] sm:$0xff]  ;;  %v2804_v20 = vpack.c.bf16 %v2110_v19, %v2109_v15 }
 0x6ec   :  { %2916 = vtanh.f32 %v1906_v24  ;;  %v2801_v11 = vpack.c.bf16 %v2108_v6, %v2107_v12  ;;  %v2111_v24 = vld [vmem:[#allocation8 + $0x70] sm:$0xff] }
 0x6ed   :  { %2918 = vtanh.f32 %v1907_v29  ;;  %v2807_v29 = vpack.c.bf16 %v2112_v28, %v2111_v24 }
 0x6ee   :  { %2920 = vtanh.f32 %v1908_v41  ;;  %v296_v41 = vmul.f32 %v3947_v54, %v230_v33 }
 0x6f5   :  { %v2915_v42 = vpop.eup %2914 }
 0x6f6   :  { %v1913_v53 = vmul.f32 0.5, %v2915_v42  ;;  %v2917_v55 = vpop.eup %2916  ;;  %v196_v42 = vmul.f32 %v3946_v46, %v128_v37 }
 0x6f7   :  { %v1914_v7 = vmul.f32 0.5, %v2917_v55  ;;  %v2919_v22 = vpop.eup %2918  ;;  %v197_v55 = vmul.f32 %v3948_v59, %v128_v37 }
 0x6f8   :  { %v1915_v4 = vadd.f32 0.5, %v1913_v53  ;;  %v2921_v27 = vpop.eup %2920  ;;  %v297_v53 = vmul.f32 %v3949_v5, %v230_v33 }
 0x6f9   :  { %v1916_v25 = vadd.f32 0.5, %v1914_v7  ;;  %v1917_v34 = vmul.f32 0.5, %v2921_v27  ;;  %v298_v7 = vmul.f32 %v3935_v0, %v230_v33  ;;  %v494_v27 = vpop.permute.xlu0 %493 }
 0x6fa   :  { %v1920_v32 = vmul.f32 %v2919_v22, %v1915_v4  ;;  %v362_v4 = vpop.permute.xlu1 %361  ;;  %v198_v22 = vmul.f32 %v3950_v13, %v128_v37  ;;  %v560_v5 = vmul.f32 %v3953_v3, %v494_v27  ;;  %v561_v59 = vmul.f32 %v3864_v48, %v494_v27 }
 0x6fb   :  { %v1919_v40 = vmul.f32 %v1916_v25, %v3670_v35  ;;  %v1918_v47 = vadd.f32 0.5, %v1917_v34  ;;  %v2100_v35 = vld [vmem:[#allocation8 + $0x18] sm:$0xff]  ;;  %v328_v25 = vadd.f32 %v296_v41, %v196_v42  ;;  %v430_v54 = vmul.f32 %v3919_v61, %v362_v4 }
 0x6fc   :  { %v2789_v16 = vpack.c.bf16 %v2100_v35, %v2099_v56  ;;  %v330_v34 = vadd.f32 %v298_v7, %v198_v22  ;;  %v562_v0 = vmul.f32 %v3305_v57, %v494_v27  ;;  %v299_v13 = vmul.f32 %v3311_v1, %v230_v33 }
 0x6fd   :  { %v3731_v51 = vadd.f32 %v1920_v32, %v1919_v40  ;;  %v428_v32 = vmul.f32 %v3951_v26, %v362_v4  ;;  %v329_v40 = vadd.f32 %v297_v53, %v197_v55  ;;  %v199_v26 = vmul.f32 %v3308_v9, %v128_v37 }
 0x6fe   :  { %v563_v9 = vmul.f32 %v3335_v17, %v494_v27 }
 0x6ff   :  { %2922 = vtanh.f32 %v3731_v51  ;;  %v460_v46 = vadd.f32 %v428_v32, %v328_v25  ;;  %v331_v8 = vadd.f32 %v299_v13, %v199_v26 }
 0x709   :  { %v2923_v44 = vpop.eup %2922 }
 0x70a   :  { %v1923_v39 = vmul.f32 %v2923_v44, %v1918_v47  ;;  %v462_v44 = vadd.f32 %v430_v54, %v330_v34 }
 0x70c   :  { %1996 = vmatmul.mubr.f32.vlgmr.msra.gmra.mrb[14].mxu0 %v1923_v39  ;;  %2067 = vmatmul.mubr.f32.vlgmr.msra.gmra.mrb[14].mxu1 %v1923_v39  ;;  %v592_v39 = vadd.f32 %v560_v5, %v460_v46 }
 0x70d   :  { %2787 = vmatpush3.bf16.msra.mxu0 %v2786_v30  ;;  %2270 = vmatprep.mubr.msk.f32.mxu0 %vm3018_vm0, %v3849_v23  ;;  %v429_v23 = vmul.f32 %v3952_v62, %v362_v4  ;;  %v594_v62 = vadd.f32 %v562_v0, %v462_v44  ;;  %v431_v30 = vmul.f32 %v3320_v10, %v362_v4 }
 0x70e   :  { %2788 = vmatprep.subr.bf16.mxu0 %v3017_v14  ;;  %v646_v61 = vadd.f32 %v3325_v45, %v592_v39 }
 0x70f   :  { %v461_v47 = vadd.f32 %v429_v23, %v329_v40  ;;  %v648_v35 = vadd.f32 %v3331_v58, %v594_v62  ;;  %v463_v1 = vadd.f32 %v431_v30, %v331_v8 }
 0x711   :  { %2790 = vmatpush3.bf16.msra.mxu0 %v2789_v16  ;;  %v593_v31 = vadd.f32 %v561_v59, %v461_v47 }
 0x712   :  { %2791 = vmatprep.subr.bf16.mxu0 %v3017_v14 }
 0x713   :  { %v647_v56 = vadd.f32 %v3328_v49, %v593_v31 }
 0x715   :  { %2793 = vmatpush3.bf16.msra.mxu0 %v2792_v38  ;;  %v595_v38 = vadd.f32 %v563_v9, %v463_v1 }
 0x716   :  { %2794 = vmatprep.subr.bf16.mxu0 %v3017_v14 }
 0x717   :  { %v649_v10 = vadd.f32 %v3342_v21, %v595_v38  ;;  %v2220_v21 = vld [vmem:[%s3776_s5] ss:$0 sm:$0xff] }
 0x719   :  { %2796 = vmatpush3.bf16.msra.mxu0 %v2795_v63 }
 0x71a   :  { %2797 = vmatprep.subr.bf16.mxu0 %v3017_v14 }
 0x71d   :  { %2799 = vmatpush3.bf16.msra.mxu0 %v2798_v60 }
 0x71e   :  { %2800 = vmatprep.subr.bf16.mxu0 %v3017_v14 }
 0x721   :  { %2802 = vmatpush3.bf16.msra.mxu0 %v2801_v11 }
 0x722   :  { %2803 = vmatprep.subr.bf16.mxu0 %v3017_v14 }
 0x725   :  { %2805 = vmatpush3.bf16.msra.mxu0 %v2804_v20 }
 0x726   :  { %2806 = vmatprep.subr.bf16.mxu0 %v3017_v14 }
 0x729   :  { %2808 = vmatpush3.bf16.msra.mxu0 %v2807_v29 }
 0x7df   :  { %v1997_v14 = vpop.f32.mrb[14].mxu0  ;;  %v2068_v3 = vpop.f32.mrb[14].mxu1 }
 0x7e0   :  { %v2073_v48 = vadd.f32 %v1997_v14, %v646_v61  ;;  %v1999_v57 = vpop.f32.mrb[15].mxu0  ;;  %v2070_v16 = vpop.f32.mrb[15].mxu1  ;;  %v2075_v43 = vadd.f32 %v2068_v3, %v648_v35 }
 0x7e1   :  { %v2074_v36 = vadd.f32 %v1999_v57, %v647_v56  ;;  %v2076_v45 = vadd.f32 %v2070_v16, %v649_v10 }
 0x7e2   :  { %2924 = vtanh.f32 %v2073_v48 }
 0x7e3   :  { %2926 = vtanh.f32 %v2074_v36 }
 0x7e4   :  { %2928 = vtanh.f32 %v2075_v43 }
 0x7e5   :  { %2930 = vtanh.f32 %v2076_v45 }
 0x7ec   :  { %v2925_v2 = vpop.eup %2924 }
 0x7ed   :  { %v2081_v50 = vmul.f32 0.5, %v2925_v2  ;;  %v2927_v49 = vpop.eup %2926 }
 0x7ee   :  { %v2082_v52 = vmul.f32 0.5, %v2927_v49  ;;  %v2929_v58 = vpop.eup %2928 }
 0x7ef   :  { %v2083_v63 = vadd.f32 0.5, %v2081_v50  ;;  %v2931_v6 = vpop.eup %2930 }
 0x7f0   :  { %v2084_v18 = vadd.f32 0.5, %v2082_v52  ;;  %v2085_v11 = vmul.f32 0.5, %v2931_v6 }
 0x7f1   :  { %v2088_v60 = vmul.f32 %v2929_v58, %v2083_v63 }
 0x7f2   :  { %v2087_v17 = vmul.f32 %v2084_v18, %v3731_v51  ;;  %v2086_v15 = vadd.f32 0.5, %v2085_v11 }
 0x7f4   :  { %v2089_v12 = vadd.f32 %v2088_v60, %v2087_v17 }
 0x7f6   :  { %2932 = vtanh.f32 %v2089_v12 }
 0x800   :  { %v2933_v19 = vpop.eup %2932 }
 0x801   :  { %v2091_v20 = vmul.f32 %v2933_v19, %v2086_v15 }
 0x803   :  { %2271 = vmatmul.mubr.f32.vlgmr.msra.gmra.mrb[16].mxu0 %v2091_v20 }
 0x8d6   :  { %v2186_v24 = vpop.f32.mrb[16].mxu0 }
 0x8d7   :  { %v2187_v28 = vadd.f32 %v2220_v21, %v2186_v24  ;;  %v2272_v29 = vpop.f32.mrb[17].mxu0 }
 0x8d9   :  { %2190 = vst [vmem:[#allocation10] sm:$0xff] %v2187_v28 }
 0x8da   :  { %2989 = shalt.err (!%p2986_p6)
}
 0x8db   :  { %s2990_s4 = scalar_lea.hbm %s3777_s6, 128 }
 0x8dc   :  { %p2991_p7 = scmp.ne.s32.totalorder %s3777_s6, %s2990_s4  ;;  %p2994_p8 = scmp.lt.u32.totalorder %s2990_s4, %s3777_s6 }
 0x8de   :  { %p2996_p9 = pnand %p2994_p8, %p2991_p7 }
 0x8e0   :  { %2999 = shalt.err (!%p2996_p9)
}
 0x8e1   :  { %2200 = dma.vmem_to_hbm [thread:$0]  %s2198_s2, 128, %s3777_s6, [#allocation7]  }
 0x8e2   :  { %3004 = dma.done.wait [#allocation7], 128  }
 0x8e3   :  { %3005 = vsyncadd [#allocation7], 4294967168 }
 0x8e4   :  { %2204 = vsyncpa [#allocation6], 1 }
 0x8e5   :  { %2205 = vsyncpa [#allocation9], 1 }
 0x8e6   :  { %2206 = vsyncpa [#allocation7], 1 }

</bundles_post_ra>
